<compile_context>
chip_gen: v5e
topology: v5e:2x2
jax: 0.10.0
libtpu: 0.0.40
codegen_flags: <defaults>
</compile_context>

<pallas_src>
import functools

import numpy as np
import jax
import jax.numpy as jnp
from jax import lax
from jax.experimental import pallas as pl
from jax.experimental.pallas import tpu as pltpu

# ----------------------------------------------------------------------------
# Model constants / packed layouts
# ----------------------------------------------------------------------------
M_HID = 32
OSC_HID = 16
X_DIM = 11

H_W = 128          # packed hidden width:  [m_s(32) | k1 k2 f1 f2 (4*16) | h1 h2 (2*16)]
U_W = 256          # packed feedback/output width (160 up/down + 6 action + pad)
G_W = 3 * 128      # fused gate width (r | z | n), each gate 128-lane aligned
XP_W = 128         # x padded to one full vreg row
ACT_OFF = 160      # action columns inside U: [160:166]

H_OFF = {"m_rnn": 0, "k_rnn1": 32, "k_rnn2": 48, "f_rnn1": 64, "f_rnn2": 80,
         "h_rnn1": 96, "h_rnn2": 112}
H_SIZE = {"m_rnn": M_HID, "k_rnn1": OSC_HID, "k_rnn2": OSC_HID,
          "f_rnn1": OSC_HID, "f_rnn2": OSC_HID, "h_rnn1": OSC_HID, "h_rnn2": OSC_HID}

U_OFF = {"h1_down": 0, "h1_up": 16, "h2_down": 32, "h2_up": 48,
         "k1_down": 64, "k1_up": 80, "k2_down": 96, "k2_up": 112,
         "f1_up": 128, "f2_up": 144}

# GRU input-segment description per cell: ("x", x-cols) | ("u", U name) | ("m", out_m half)
CELL_SEGS = {
    "m_rnn":  [("x", [0, 1, 8, 9, 10]), ("u", "h1_up"), ("u", "h2_up")],
    "h_rnn1": [("x", [2]), ("m", 0), ("u", "k1_up")],
    "h_rnn2": [("x", [5]), ("m", 1), ("u", "k2_up")],
    "k_rnn1": [("x", [3]), ("u", "h1_down"), ("u", "f1_up")],
    "k_rnn2": [("x", [6]), ("u", "h2_down"), ("u", "f2_up")],
    "f_rnn1": [("x", [4]), ("u", "k1_down")],
    "f_rnn2": [("x", [7]), ("u", "k2_down")],
}

GRU_SPECS = {  # name -> (input_dim, hidden_dim)  (canonical / PyTorch shapes)
    "m_rnn": (5 + 2 * OSC_HID, M_HID),
    "h_rnn1": (1 + 2 * OSC_HID, OSC_HID), "h_rnn2": (1 + 2 * OSC_HID, OSC_HID),
    "k_rnn1": (1 + 2 * OSC_HID, OSC_HID), "k_rnn2": (1 + 2 * OSC_HID, OSC_HID),
    "f_rnn1": (1 + OSC_HID, OSC_HID), "f_rnn2": (1 + OSC_HID, OSC_HID),
}

LIN_SPECS = {  # name -> (in_features, out_features)
    "m_out": (M_HID, 2 * OSC_HID),
    "h_out1": (OSC_HID, 1), "h_out2": (OSC_HID, 1),
    "h_out1_down": (OSC_HID, OSC_HID), "h_out2_down": (OSC_HID, OSC_HID),
    "h_out1_up": (OSC_HID, OSC_HID), "h_out2_up": (OSC_HID, OSC_HID),
    "k_out1": (OSC_HID, 1), "k_out2": (OSC_HID, 1),
    "k_out1_down": (OSC_HID, OSC_HID), "k_out2_down": (OSC_HID, OSC_HID),
    "k_out1_up": (OSC_HID, OSC_HID), "k_out2_up": (OSC_HID, OSC_HID),
    "f_out1": (OSC_HID, 1), "f_out2": (OSC_HID, 1),
    "f_out1_up": (OSC_HID, OSC_HID), "f_out2_up": (OSC_HID, OSC_HID),
}

# fused output linear: linear name -> (H offset of its hidden input, U offset of its output)
LIN_MAP = {
    "h_out1_down": (96, 0),  "h_out1_up": (96, 16),
    "h_out2_down": (112, 32), "h_out2_up": (112, 48),
    "k_out1_down": (32, 64), "k_out1_up": (32, 80),
    "k_out2_down": (48, 96), "k_out2_up": (48, 112),
    "f_out1_up": (64, 128),  "f_out2_up": (80, 144),
}
# action = cat([h_out1, k_out1, f_out1, h_out2, k_out2, f_out2])
ACTION_HEADS = [("h_out1", 96), ("k_out1", 32), ("f_out1", 64),
                ("h_out2", 112), ("k_out2", 48), ("f_out2", 80)]

STATE_NAMES = ["m_s", "h1_s", "h2_s", "k1_s", "k2_s", "f1_s", "f2_s",
               "h1_down", "h1_up", "h2_down", "h2_up",
               "k1_down", "k1_up", "k2_down", "k2_up", "f1_up", "f2_up"]


# ----------------------------------------------------------------------------
# Canonical (PyTorch-shaped) parameters, deterministic init
# ----------------------------------------------------------------------------
def init_canonical_params(key):
    params = {}
    keys = iter(jax.random.split(key, 128))

    def u(k, shape, fan):
        bound = 1.0 / np.sqrt(float(fan))
        return jax.random.uniform(k, shape, jnp.float32, -bound, bound)

    for name, (ind, hid) in GRU_SPECS.items():
        params[name] = dict(
            w_ih=u(next(keys), (3 * hid, ind), hid),
            w_hh=u(next(keys), (3 * hid, hid), hid),
            b_ih=u(next(keys), (3 * hid,), hid),
            b_hh=u(next(keys), (3 * hid,), hid),
        )
    for name, (ind, outd) in LIN_SPECS.items():
        params[name] = dict(w=u(next(keys), (outd, ind), ind),
                            b=u(next(keys), (outd,), ind))
    return params


# ----------------------------------------------------------------------------
# Pack canonical params into the fused kernel layout (host-side glue only)
# ----------------------------------------------------------------------------
def build_packed_params(canon):
    wx = np.zeros((XP_W, G_W), np.float32)    # x      -> gates
    wu = np.zeros((U_W, G_W), np.float32)     # U_prev -> gates
    wh = np.zeros((H_W, G_W), np.float32)     # H_prev -> gates (block-diag)
    wm = np.zeros((H_W, G_W), np.float32)     # new m_s -> h-cell gates (m_out folded in)
    b_i = np.zeros((1, G_W), np.float32)
    b_h = np.zeros((1, G_W), np.float32)

    m_out_wT = np.asarray(canon["m_out"]["w"], np.float32).T      # (m_hid, 2*osc)
    m_out_b = np.asarray(canon["m_out"]["b"], np.float32)         # (2*osc,)

    for cell, segs in CELL_SEGS.items():
        hid = H_SIZE[cell]
        off = H_OFF[cell]
        wiT = np.asarray(canon[cell]["w_ih"], np.float32).T       # (in, 3*hid)
        whT = np.asarray(canon[cell]["w_hh"], np.float32).T       # (hid, 3*hid)
        bi = np.asarray(canon[cell]["b_ih"], np.float32)
        bh = np.asarray(canon[cell]["b_hh"], np.float32)
        for g in range(3):                                        # r, z, n
            cs, ce = 128 * g + off, 128 * g + off + hid           # fused gate columns
            src = slice(g * hid, (g + 1) * hid)                   # cell-local gate cols
            wh[off:off + hid, cs:ce] = whT[:, src]
            b_i[0, cs:ce] = bi[src]
            b_h[0, cs:ce] = bh[src]
            row = 0
            for kind, spec in segs:
                if kind == "x":
                    for j, xi in enumerate(spec):
                        wx[xi, cs:ce] += wiT[row + j, src]
                    row += len(spec)
                elif kind == "u":
                    uo = U_OFF[spec]
                    wu[uo:uo + OSC_HID, cs:ce] = wiT[row:row + OSC_HID, src]
                    row += OSC_HID
                else:  # "m": out_m half (m_out linear folded through the GRU input weight)
                    A = m_out_wT[:, spec * OSC_HID:(spec + 1) * OSC_HID]   # (m_hid, osc)
                    B = wiT[row:row + OSC_HID, src]                        # (osc, hid)
                    wm[0:M_HID, cs:ce] = A @ B
                    b_i[0, cs:ce] += m_out_b[spec * OSC_HID:(spec + 1) * OSC_HID] @ B
                    row += OSC_HID

    # Sparsity pattern the two-pass GRU update relies on: wm only reads the new
    # m_s lanes (rows 0:32) and only writes the h-cell gate columns.
    assert not wm[M_HID:, :].any(), "wm rows beyond m_s must stay zero"
    h_cols = np.zeros(G_W, bool)
    for g in range(3):
        h_cols[128 * g + 96:128 * g + 128] = True
    assert not wm[:, ~h_cols].any(), "wm must only touch h-cell gate columns"

    # 16 output linears fused into one (H_W, U_W) matmul
    wout = np.zeros((H_W, U_W), np.float32)
    b_out = np.zeros((1, U_W), np.float32)
    for name, (ho, uo) in LIN_MAP.items():
        wout[ho:ho + OSC_HID, uo:uo + OSC_HID] = np.asarray(canon[name]["w"], np.float32).T
        b_out[0, uo:uo + OSC_HID] = np.asarray(canon[name]["b"], np.float32)
    for col, (name, ho) in enumerate(ACTION_HEADS):
        wout[ho:ho + OSC_HID, ACT_OFF + col] = np.asarray(canon[name]["w"], np.float32)[0]
        b_out[0, ACT_OFF + col] = np.asarray(canon[name]["b"], np.float32)[0]

    # Fold wu into the recurrent path: u_prev = h_prev @ wout + b_out (t >= 1), so
    #   wrec = [wh | wout @ wu]   and   b_i_eff = b_i + b_out @ wu.
    wuh = wout @ wu                                            # (H_W, G_W)
    wrec = np.concatenate([wh, wuh], axis=1)                   # (H_W, 2*G_W)
    b_i_eff = b_i + b_out @ wu                                 # (1, G_W)

    to_j = lambda a: jnp.asarray(a, jnp.float32)
    return dict(wx=to_j(wx), wrec=to_j(wrec), wm=to_j(wm), wout=to_j(wout),
                b_i_eff=to_j(b_i_eff), b_h=to_j(b_h), b_out=to_j(b_out),
                wu=to_j(wu))


# ----------------------------------------------------------------------------
# Pallas kernel: one grid step = CHUNK recurrent steps, state resident in VMEM
# ----------------------------------------------------------------------------
def _rnet3_kernel(x_ref, wx_ref, wrec_ref, wm_ref, wout_ref,
                  bi_ref, bh_ref, bo_ref, corr0_ref, h0_ref,
                  y_ref, hf_ref, uf_ref,
                  h_sc, gix_sc, hbuf_sc,
                  *, chunk, t_total):
    c = pl.program_id(0)
    last_c = pl.num_programs(0) - 1

    def mm(a, b):  # default precision: single bf16 MXU pass, f32 accumulate
        return jnp.dot(a, b, preferred_element_type=jnp.float32)

    @pl.when(c == 0)
    def _init():
        h_sc[...] = h0_ref[...]

    # ---- Hoisted input projection for the whole chunk (off the serial chain):
    #      GI_X = Xpad @ wx + b_i_eff, one well-utilized (CHUNK,128)@(128,384).
    gix_sc[...] = mm(x_ref[...], wx_ref[...]) + bi_ref[...]

    @pl.when(c == 0)
    def _step0_fix():
        # wu was folded assuming u_prev = h_prev @ wout + b_out; apply the
        # true-u0 correction to the very first step only.
        gix_sc[0:1, :] = gix_sc[0:1, :] + corr0_ref[...]

    n_valid = jnp.minimum(chunk, t_total - c * chunk)
    bh_vec = bh_ref[...]                                   # (1, 384)

    def step(i, h_prev):
        # Serial chain per step: 2 matmuls (wrec fused [wh|wout@wu], wm) + gates.
        g = mm(h_prev, wrec_ref[...])                      # (1, 768)
        gh = g[:, :G_W] + bh_vec
        gi0 = gix_sc[pl.ds(i, 1), :] + g[:, G_W:]
        gh_r = gh[:, 0:H_W]
        gh_z = gh[:, H_W:2 * H_W]
        gh_n = gh[:, 2 * H_W:3 * H_W]

        def gru(gi):
            r = jax.nn.sigmoid(gi[:, 0:H_W] + gh_r)
            z = jax.nn.sigmoid(gi[:, H_W:2 * H_W] + gh_z)
            n = jnp.tanh(gi[:, 2 * H_W:3 * H_W] + r * gh_n)
            return (1.0 - z) * n + z * h_prev

        # Pass 1: m/k/f lanes final; h1/h2 lanes provisional.
        h_part = gru(gi0)
        # Fold out_m(new m_s) into the h-cell gate pre-activations (wm is only
        # nonzero in rows 0:32 and the h-cell columns of each gate).
        gi1 = gi0 + mm(h_part, wm_ref[...])
        # Pass 2: all 128 lanes final (non-h lanes recompute identically).
        h_new = gru(gi1)

        hbuf_sc[pl.ds(i, 1), :] = h_new
        # Mask out padded steps in the last chunk so the carried state stops at T.
        return jnp.where(i < n_valid, h_new, h_prev)

    h_last = lax.fori_loop(0, chunk, step, h_sc[...])
    h_sc[...] = h_last

    # ---- Deferred output projection: all 16 output Linears as one matmul/chunk.
    y_ref[...] = mm(hbuf_sc[...], wout_ref[...]) + bo_ref[...]

    @pl.when(c == last_c)
    def _finalize():
        hf_ref[...] = h_last
        uf_ref[...] = mm(h_last, wout_ref[...]) + bo_ref[...]


def rnet3_rollout_pallas(x_seq, packed, h0, u0, chunk=512):
    """Run T recurrent steps of RNet3 in a single (chunked) pallas_call.

    x_seq: (T, 11) observations.  Returns (actions (T,6), final H (1,128),
    final U (1,256)).  h0/u0 are the packed recurrent state (zeros == reset()).
    """
    T = int(x_seq.shape[0])
    CHUNK = int(min(chunk, max(8, ((T + 7) // 8) * 8)))
    n_chunks = (T + CHUNK - 1) // CHUNK
    T_pad = n_chunks * CHUNK

    xp = jnp.zeros((T_pad, XP_W), jnp.float32)
    xp = xp.at[:T, :X_DIM].set(x_seq.astype(jnp.float32))

    # Step-0 correction for the wu->wrec fold (true u0 vs implied h0@wout+b_out).
    corr0 = (u0 - (h0 @ packed["wout"] + packed["b_out"])) @ packed["wu"]   # (1, G_W)

    kernel = functools.partial(_rnet3_kernel, chunk=CHUNK, t_total=T)
    const2 = lambda c: (0, 0)

    y, h_fin, u_fin = pl.pallas_call(
        kernel,
        grid=(n_chunks,),
        in_specs=[
            pl.BlockSpec((CHUNK, XP_W), lambda c: (c, 0)),   # x chunk
            pl.BlockSpec((XP_W, G_W), const2),               # wx        (resident)
            pl.BlockSpec((H_W, 2 * G_W), const2),            # wrec=[wh|wout@wu]
            pl.BlockSpec((H_W, G_W), const2),                # wm        (resident)
            pl.BlockSpec((H_W, U_W), const2),                # wout      (resident)
            pl.BlockSpec((1, G_W), const2),                  # b_i_eff
            pl.BlockSpec((1, G_W), const2),                  # b_h
            pl.BlockSpec((1, U_W), const2),                  # b_out
            pl.BlockSpec((1, G_W), const2),                  # step-0 u correction
            pl.BlockSpec((1, H_W), const2),                  # initial packed hidden
        ],
        out_specs=(
            pl.BlockSpec((CHUNK, U_W), lambda c: (c, 0)),    # per-step packed output
            pl.BlockSpec((1, H_W), const2),                  # final hidden
            pl.BlockSpec((1, U_W), const2),                  # final feedback
        ),
        out_shape=(
            jax.ShapeDtypeStruct((T_pad, U_W), jnp.float32),
            jax.ShapeDtypeStruct((1, H_W), jnp.float32),
            jax.ShapeDtypeStruct((1, U_W), jnp.float32),
        ),
        scratch_shapes=[
            pltpu.VMEM((1, H_W), jnp.float32),        # carried recurrent state
            pltpu.VMEM((CHUNK, G_W), jnp.float32),    # hoisted input projection
            pltpu.VMEM((CHUNK, H_W), jnp.float32),    # per-step hidden buffer
        ],
        compiler_params=pltpu.CompilerParams(
            dimension_semantics=("arbitrary",)),
    )(xp, packed["wx"], packed["wrec"], packed["wm"], packed["wout"],
      packed["b_i_eff"], packed["b_h"], packed["b_out"], corr0, h0)

    actions = y[:T, ACT_OFF:ACT_OFF + 6]
    return actions, h_fin, u_fin


# ----------------------------------------------------------------------------
# Pure-numpy reference (literal translation of the PyTorch forward)
# ----------------------------------------------------------------------------
def reference_forward(x, canon, st, osc_hid):
    f = lambda a: np.asarray(a, np.float64)
    sig = lambda v: 1.0 / (1.0 + np.exp(-v))

    def gru(inp, h, p):
        gi = inp @ f(p["w_ih"]).T + f(p["b_ih"])
        gh = h @ f(p["w_hh"]).T + f(p["b_hh"])
        hid = h.shape[1]
        r = sig(gi[:, :hid] + gh[:, :hid])
        z = sig(gi[:, hid:2 * hid] + gh[:, hid:2 * hid])
        n = np.tanh(gi[:, 2 * hid:] + r * gh[:, 2 * hid:])
        return (1.0 - z) * n + z * h

    def lin(inp, p):
        return inp @ f(p["w"]).T + f(p["b"])

    h1 = x[:, 2:3]; k1 = x[:, 3:4]; f1 = x[:, 4:5]
    h2 = x[:, 5:6]; k2 = x[:, 6:7]; f2 = x[:, 7:8]
    m_obs = x[:, [0, 1, 8, 9, 10]]

    m_s = gru(np.concatenate([m_obs, st["h1_up"], st["h2_up"]], 1), st["m_s"], canon["m_rnn"])
    out_m = lin(m_s, canon["m_out"])
    h1_s = gru(np.concatenate([h1, out_m[:, :osc_hid], st["k1_up"]], 1), st["h1_s"], canon["h_rnn1"])
    h2_s = gru(np.concatenate([h2, out_m[:, osc_hid:], st["k2_up"]], 1), st["h2_s"], canon["h_rnn2"])
    k1_s = gru(np.concatenate([k1, st["h1_down"], st["f1_up"]], 1), st["k1_s"], canon["k_rnn1"])
    k2_s = gru(np.concatenate([k2, st["h2_down"], st["f2_up"]], 1), st["k2_s"], canon["k_rnn2"])
    f1_s = gru(np.concatenate([f1, st["k1_down"]], 1), st["f1_s"], canon["f_rnn1"])
    f2_s = gru(np.concatenate([f2, st["k2_down"]], 1), st["f2_s"], canon["f_rnn2"])

    out_h1 = lin(h1_s, canon["h_out1"]); out_h2 = lin(h2_s, canon["h_out2"])
    out_k1 = lin(k1_s, canon["k_out1"]); out_k2 = lin(k2_s, canon["k_out2"])
    out_f1 = lin(f1_s, canon["f_out1"]); out_f2 = lin(f2_s, canon["f_out2"])

    new_st = {
        "m_s": m_s, "h1_s": h1_s, "h2_s": h2_s, "k1_s": k1_s, "k2_s": k2_s,
        "f1_s": f1_s, "f2_s": f2_s,
        "h1_down": lin(h1_s, canon["h_out1_down"]), "h1_up": lin(h1_s, canon["h_out1_up"]),
        "h2_down": lin(h2_s, canon["h_out2_down"]), "h2_up": lin(h2_s, canon["h_out2_up"]),
        "k1_down": lin(k1_s, canon["k_out1_down"]), "k1_up": lin(k1_s, canon["k_out1_up"]),
        "k2_down": lin(k2_s, canon["k_out2_down"]), "k2_up": lin(k2_s, canon["k_out2_up"]),
        "f1_up": lin(f1_s, canon["f_out1_up"]), "f2_up": lin(f2_s, canon["f_out2_up"]),
    }
    action = np.concatenate([out_h1, out_k1, out_f1, out_h2, out_k2, out_f2], 1)
    return action, new_st


# ----------------------------------------------------------------------------
if __name__ == "__main__":
    key = jax.random.PRNGKey(0)
    kx, kp = jax.random.split(key)

    canon = init_canonical_params(kp)
    packed = build_packed_params(canon)

    T1, T2 = 5, 3                         # seq = 8 total, split over two calls
    x_all = jax.random.normal(kx, (T1 + T2, X_DIM), dtype=jnp.float32)

    h0 = jnp.zeros((1, H_W), jnp.float32)  # module reset(): all-zero state
    u0 = jnp.zeros((1, U_W), jnp.float32)

    # Two fused rollouts, carrying the packed recurrent state across calls.
    act1, h_mid, u_mid = rnet3_rollout_pallas(x_all[:T1], packed, h0, u0)
    act2, h_fin, u_fin = rnet3_rollout_pallas(x_all[T1:], packed, h_mid, u_mid)
    actions = jnp.concatenate([act1, act2], axis=0)
    actions, h_fin, u_fin = jax.block_until_ready((actions, h_fin, u_fin))

    # numpy/f64 reference, stepped T1+T2 times
    st = {n: np.zeros((1, M_HID if n == "m_s" else OSC_HID), np.float64)
          for n in STATE_NAMES}
    xs_np = np.asarray(x_all, np.float64)
    ref_actions = []
    for tt in range(T1 + T2):
        a, st = reference_forward(xs_np[tt:tt + 1], canon, st, OSC_HID)
        ref_actions.append(a)
    ref_actions = np.concatenate(ref_actions, 0)

    # Tolerances account for default-precision (bf16 MXU operand) matmuls.
    ATOL, RTOL = 2e-2, 2e-2
    np.testing.assert_allclose(np.asarray(actions, np.float64), ref_actions,
                               atol=ATOL, rtol=RTOL)

    ref_h = np.concatenate([st["m_s"], st["k1_s"], st["k2_s"], st["f1_s"],
                            st["f2_s"], st["h1_s"], st["h2_s"]], 1)
    np.testing.assert_allclose(np.asarray(h_fin, np.float64), ref_h,
                               atol=ATOL, rtol=RTOL)

    ref_u = np.concatenate([st["h1_down"], st["h1_up"], st["h2_down"], st["h2_up"],
                            st["k1_down"], st["k1_up"], st["k2_down"], st["k2_up"],
                            st["f1_up"], st["f2_up"]], 1)
    np.testing.assert_allclose(np.asarray(u_fin[:, :160], np.float64), ref_u,
                               atol=ATOL, rtol=RTOL)

    print("KERNEL_OK")
</pallas_src>

<mosaic_0001>
module attributes {stable_mosaic.version = 11 : i64} {
  func.func @_rnet3_kernel(%arg0: i32, %arg1: memref<8x128xf32, #tpu.memory_space<vmem>>, %arg2: memref<128x384xf32, #tpu.memory_space<vmem>>, %arg3: memref<128x768xf32, #tpu.memory_space<vmem>>, %arg4: memref<128x384xf32, #tpu.memory_space<vmem>>, %arg5: memref<128x256xf32, #tpu.memory_space<vmem>>, %arg6: memref<1x384xf32, #tpu.memory_space<vmem>>, %arg7: memref<1x384xf32, #tpu.memory_space<vmem>>, %arg8: memref<1x256xf32, #tpu.memory_space<vmem>>, %arg9: memref<1x384xf32, #tpu.memory_space<vmem>>, %arg10: memref<1x128xf32, #tpu.memory_space<vmem>>, %arg11: memref<8x256xf32, #tpu.memory_space<vmem>>, %arg12: memref<1x128xf32, #tpu.memory_space<vmem>>, %arg13: memref<1x256xf32, #tpu.memory_space<vmem>>, %arg14: memref<1x128xf32, #tpu.memory_space<vmem>>, %arg15: memref<8x384xf32, #tpu.memory_space<vmem>>, %arg16: memref<8x128xf32, #tpu.memory_space<vmem>>) attributes {dimension_semantics = [#tpu.dimension_semantics<arbitrary>], iteration_bounds = array<i64: 1>, scalar_prefetch = 0 : i64, scratch_operands = 3 : i64, tpu.core_type = #tpu.core_type<tc>, window_params = [{transform_indices = @transform_0, window_bounds = array<i64: 8, 128>}, {pipeline_mode = #tpu.pipeline_mode<synchronous>, transform_indices = @transform_1, window_bounds = array<i64: 128, 384>}, {pipeline_mode = #tpu.pipeline_mode<synchronous>, transform_indices = @transform_2, window_bounds = array<i64: 128, 768>}, {pipeline_mode = #tpu.pipeline_mode<synchronous>, transform_indices = @transform_3, window_bounds = array<i64: 128, 384>}, {pipeline_mode = #tpu.pipeline_mode<synchronous>, transform_indices = @transform_4, window_bounds = array<i64: 128, 256>}, {pipeline_mode = #tpu.pipeline_mode<synchronous>, transform_indices = @transform_5, window_bounds = array<i64: 1, 384>}, {pipeline_mode = #tpu.pipeline_mode<synchronous>, transform_indices = @transform_6, window_bounds = array<i64: 1, 384>}, {pipeline_mode = #tpu.pipeline_mode<synchronous>, transform_indices = @transform_7, window_bounds = array<i64: 1, 256>}, {pipeline_mode = #tpu.pipeline_mode<synchronous>, transform_indices = @transform_8, window_bounds = array<i64: 1, 384>}, {pipeline_mode = #tpu.pipeline_mode<synchronous>, transform_indices = @transform_9, window_bounds = array<i64: 1, 128>}, {transform_indices = @transform_10, window_bounds = array<i64: 8, 256>}, {pipeline_mode = #tpu.pipeline_mode<synchronous>, transform_indices = @transform_11, window_bounds = array<i64: 1, 128>}, {pipeline_mode = #tpu.pipeline_mode<synchronous>, transform_indices = @transform_12, window_bounds = array<i64: 1, 256>}]} {
    %c0_i32 = arith.constant 0 : i32
    %0 = arith.cmpi eq, %arg0, %c0_i32 : i32
    %1 = arith.extui %0 : i1 to i32
    %c0_i32_0 = arith.constant 0 : i32
    %2 = arith.cmpi ne, %1, %c0_i32_0 : i32
    scf.if %2 {
      %c0_31 = arith.constant 0 : index
      %c0_32 = arith.constant 0 : index
      %31 = vector.load %arg10[%c0_31, %c0_32] : memref<1x128xf32, #tpu.memory_space<vmem>>, vector<1x128xf32>
      %c0_33 = arith.constant 0 : index
      %c0_34 = arith.constant 0 : index
      %32 = vector.load %arg14[%c0_33, %c0_34] : memref<1x128xf32, #tpu.memory_space<vmem>>, vector<1x128xf32>
      tpu.vector_store %arg14[%c0_33, %c0_34], %31 {strides = array<i32>} : memref<1x128xf32, #tpu.memory_space<vmem>>, vector<1x128xf32>,
    } else {
    }
    %c0 = arith.constant 0 : index
    %c0_1 = arith.constant 0 : index
    %3 = vector.load %arg1[%c0, %c0_1] : memref<8x128xf32, #tpu.memory_space<vmem>>, vector<8x128xf32>
    %c0_2 = arith.constant 0 : index
    %c0_3 = arith.constant 0 : index
    %4 = vector.load %arg2[%c0_2, %c0_3] : memref<128x384xf32, #tpu.memory_space<vmem>>, vector<128x384xf32>
    %cst = arith.constant dense<0.000000e+00> : vector<8x384xf32>
    %5 = tpu.matmul %3, %4, %cst {dimension_numbers = #tpu.dot_dimension_numbers<[1], [0], [0], [1], [0, 0, 1, 1], [], []>} : vector<8x128xf32>, vector<128x384xf32>, vector<8x384xf32> -> vector<8x384xf32>
    %c0_4 = arith.constant 0 : index
    %c0_5 = arith.constant 0 : index
    %6 = vector.load %arg6[%c0_4, %c0_5] : memref<1x384xf32, #tpu.memory_space<vmem>>, vector<1x384xf32>
    %7 = vector.broadcast %6 : vector<1x384xf32> to vector<8x384xf32>
    %8 = arith.addf %5, %7 : vector<8x384xf32>
    %c0_6 = arith.constant 0 : index
    %c0_7 = arith.constant 0 : index
    %9 = vector.load %arg15[%c0_6, %c0_7] : memref<8x384xf32, #tpu.memory_space<vmem>>, vector<8x384xf32>
    tpu.vector_store %arg15[%c0_6, %c0_7], %8 {strides = array<i32>} : memref<8x384xf32, #tpu.memory_space<vmem>>, vector<8x384xf32>,
    %c0_i32_8 = arith.constant 0 : i32
    %10 = arith.cmpi eq, %arg0, %c0_i32_8 : i32
    %11 = arith.extui %10 : i1 to i32
    %c0_i32_9 = arith.constant 0 : i32
    %12 = arith.cmpi ne, %11, %c0_i32_9 : i32
    scf.if %12 {
      %c0_31 = arith.constant 0 : index
      %c0_32 = arith.constant 0 : index
      %31 = vector.load %arg15[%c0_31, %c0_32] : memref<8x384xf32, #tpu.memory_space<vmem>>, vector<1x384xf32>
      %c0_33 = arith.constant 0 : index
      %c0_34 = arith.constant 0 : index
      %32 = vector.load %arg9[%c0_33, %c0_34] : memref<1x384xf32, #tpu.memory_space<vmem>>, vector<1x384xf32>
      %33 = arith.addf %31, %32 : vector<1x384xf32>
      %c0_35 = arith.constant 0 : index
      %c0_36 = arith.constant 0 : index
      %34 = vector.load %arg15[%c0_35, %c0_36] : memref<8x384xf32, #tpu.memory_space<vmem>>, vector<1x384xf32>
      tpu.vector_store %arg15[%c0_35, %c0_36], %33 {strides = array<i32>} : memref<8x384xf32, #tpu.memory_space<vmem>>, vector<1x384xf32>,
    } else {
    }
    %c8_i32 = arith.constant 8 : i32
    %13 = arith.muli %arg0, %c8_i32 : i32
    %c5_i32 = arith.constant 5 : i32
    %14 = arith.subi %c5_i32, %13 : i32
    %c8_i32_10 = arith.constant 8 : i32
    %15 = arith.minsi %c8_i32_10, %14 : i32
    %c0_11 = arith.constant 0 : index
    %c0_12 = arith.constant 0 : index
    %16 = vector.load %arg7[%c0_11, %c0_12] : memref<1x384xf32, #tpu.memory_space<vmem>>, vector<1x384xf32>
    %c0_13 = arith.constant 0 : index
    %c0_14 = arith.constant 0 : index
    %17 = vector.load %arg14[%c0_13, %c0_14] : memref<1x128xf32, #tpu.memory_space<vmem>>, vector<1x128xf32>
    %c0_i32_15 = arith.constant 0 : i32
    %c8_i32_16 = arith.constant 8 : i32
    %18 = arith.addi %c0_i32_15, %c8_i32_16 : i32
    %c1_i32 = arith.constant 1 : i32
    %19 = scf.for %arg17 = %c0_i32_15 to %18 step %c1_i32 iter_args(%arg18 = %17) -> (vector<1x128xf32>)  : i32 {
      %c0_31 = arith.constant 0 : index
      %c0_32 = arith.constant 0 : index
      %31 = vector.load %arg3[%c0_31, %c0_32] : memref<128x768xf32, #tpu.memory_space<vmem>>, vector<128x768xf32>
      %cst_33 = arith.constant dense<0.000000e+00> : vector<1x768xf32>
      %32 = tpu.matmul %arg18, %31, %cst_33 {dimension_numbers = #tpu.dot_dimension_numbers<[1], [0], [0], [1], [0, 0, 1, 1], [], []>} : vector<1x128xf32>, vector<128x768xf32>, vector<1x768xf32> -> vector<1x768xf32>
      %33 = vector.extract_strided_slice %32 {offsets = [0, 0], sizes = [1, 384], strides = [1, 1]} : vector<1x768xf32> to vector<1x384xf32>
      %34 = arith.addf %33, %16 : vector<1x384xf32>
      %35 = arith.index_cast %arg17 : i32 to index
      %c0_34 = arith.constant 0 : index
      %36 = vector.load %arg15[%35, %c0_34] : memref<8x384xf32, #tpu.memory_space<vmem>>, vector<1x384xf32>
      %37 = vector.extract_strided_slice %32 {offsets = [0, 384], sizes = [1, 384], strides = [1, 1]} : vector<1x768xf32> to vector<1x384xf32>
      %38 = arith.addf %36, %37 : vector<1x384xf32>
      %39 = vector.extract_strided_slice %34 {offsets = [0, 0], sizes = [1, 128], strides = [1, 1]} : vector<1x384xf32> to vector<1x128xf32>
      %40 = vector.extract_strided_slice %34 {offsets = [0, 128], sizes = [1, 128], strides = [1, 1]} : vector<1x384xf32> to vector<1x128xf32>
      %41 = vector.extract_strided_slice %34 {offsets = [0, 256], sizes = [1, 128], strides = [1, 1]} : vector<1x384xf32> to vector<1x128xf32>
      %42 = vector.extract_strided_slice %38 {offsets = [0, 0], sizes = [1, 128], strides = [1, 1]} : vector<1x384xf32> to vector<1x128xf32>
      %43 = arith.addf %42, %39 : vector<1x128xf32>
      %44 = arith.negf %43 : vector<1x128xf32>
      %45 = math.exp %44 : vector<1x128xf32>
      %cst_35 = arith.constant 1.000000e+00 : f32
      %46 = vector.broadcast %cst_35 : f32 to vector<1x128xf32>
      %47 = arith.addf %46, %45 : vector<1x128xf32>
      %48 = arith.divf %46, %47 : vector<1x128xf32>
      %49 = vector.extract_strided_slice %38 {offsets = [0, 128], sizes = [1, 128], strides = [1, 1]} : vector<1x384xf32> to vector<1x128xf32>
      %50 = arith.addf %49, %40 : vector<1x128xf32>
      %51 = arith.negf %50 : vector<1x128xf32>
      %52 = math.exp %51 : vector<1x128xf32>
      %cst_36 = arith.constant 1.000000e+00 : f32
      %53 = vector.broadcast %cst_36 : f32 to vector<1x128xf32>
      %54 = arith.addf %53, %52 : vector<1x128xf32>
      %55 = arith.divf %53, %54 : vector<1x128xf32>
      %56 = vector.extract_strided_slice %38 {offsets = [0, 256], sizes = [1, 128], strides = [1, 1]} : vector<1x384xf32> to vector<1x128xf32>
      %57 = arith.mulf %48, %41 : vector<1x128xf32>
      %58 = arith.addf %56, %57 : vector<1x128xf32>
      %59 = math.tanh %58 : vector<1x128xf32>
      %cst_37 = arith.constant 1.000000e+00 : f32
      %60 = vector.broadcast %cst_37 : f32 to vector<1x128xf32>
      %61 = arith.subf %60, %55 : vector<1x128xf32>
      %62 = arith.mulf %61, %59 : vector<1x128xf32>
      %63 = arith.mulf %55, %arg18 : vector<1x128xf32>
      %64 = arith.addf %62, %63 : vector<1x128xf32>
      %c0_38 = arith.constant 0 : index
      %c0_39 = arith.constant 0 : index
      %65 = vector.load %arg4[%c0_38, %c0_39] : memref<128x384xf32, #tpu.memory_space<vmem>>, vector<128x384xf32>
      %cst_40 = arith.constant dense<0.000000e+00> : vector<1x384xf32>
      %66 = tpu.matmul %64, %65, %cst_40 {dimension_numbers = #tpu.dot_dimension_numbers<[1], [0], [0], [1], [0, 0, 1, 1], [], []>} : vector<1x128xf32>, vector<128x384xf32>, vector<1x384xf32> -> vector<1x384xf32>
      %67 = arith.addf %38, %66 : vector<1x384xf32>
      %68 = vector.extract_strided_slice %67 {offsets = [0, 0], sizes = [1, 128], strides = [1, 1]} : vector<1x384xf32> to vector<1x128xf32>
      %69 = arith.addf %68, %39 : vector<1x128xf32>
      %70 = arith.negf %69 : vector<1x128xf32>
      %71 = math.exp %70 : vector<1x128xf32>
      %cst_41 = arith.constant 1.000000e+00 : f32
      %72 = vector.broadcast %cst_41 : f32 to vector<1x128xf32>
      %73 = arith.addf %72, %71 : vector<1x128xf32>
      %74 = arith.divf %72, %73 : vector<1x128xf32>
      %75 = vector.extract_strided_slice %67 {offsets = [0, 128], sizes = [1, 128], strides = [1, 1]} : vector<1x384xf32> to vector<1x128xf32>
      %76 = arith.addf %75, %40 : vector<1x128xf32>
      %77 = arith.negf %76 : vector<1x128xf32>
      %78 = math.exp %77 : vector<1x128xf32>
      %cst_42 = arith.constant 1.000000e+00 : f32
      %79 = vector.broadcast %cst_42 : f32 to vector<1x128xf32>
      %80 = arith.addf %79, %78 : vector<1x128xf32>
      %81 = arith.divf %79, %80 : vector<1x128xf32>
      %82 = vector.extract_strided_slice %67 {offsets = [0, 256], sizes = [1, 128], strides = [1, 1]} : vector<1x384xf32> to vector<1x128xf32>
      %83 = arith.mulf %74, %41 : vector<1x128xf32>
      %84 = arith.addf %82, %83 : vector<1x128xf32>
      %85 = math.tanh %84 : vector<1x128xf32>
      %cst_43 = arith.constant 1.000000e+00 : f32
      %86 = vector.broadcast %cst_43 : f32 to vector<1x128xf32>
      %87 = arith.subf %86, %81 : vector<1x128xf32>
      %88 = arith.mulf %87, %85 : vector<1x128xf32>
      %89 = arith.mulf %81, %arg18 : vector<1x128xf32>
      %90 = arith.addf %88, %89 : vector<1x128xf32>
      %91 = arith.index_cast %arg17 : i32 to index
      %c0_44 = arith.constant 0 : index
      %92 = vector.load %arg16[%91, %c0_44] : memref<8x128xf32, #tpu.memory_space<vmem>>, vector<1x128xf32>
      tpu.vector_store %arg16[%91, %c0_44], %90 {strides = array<i32>} : memref<8x128xf32, #tpu.memory_space<vmem>>, vector<1x128xf32>,
      %93 = arith.cmpi slt, %arg17, %15 : i32
      %94 = arith.select %93, %90, %arg18 : vector<1x128xf32>
      scf.yield %94 : vector<1x128xf32>
    }
    %c8_i32_17 = arith.constant 8 : i32
    %c0_18 = arith.constant 0 : index
    %c0_19 = arith.constant 0 : index
    %20 = vector.load %arg14[%c0_18, %c0_19] : memref<1x128xf32, #tpu.memory_space<vmem>>, vector<1x128xf32>
    tpu.vector_store %arg14[%c0_18, %c0_19], %19 {strides = array<i32>} : memref<1x128xf32, #tpu.memory_space<vmem>>, vector<1x128xf32>,
    %c0_20 = arith.constant 0 : index
    %c0_21 = arith.constant 0 : index
    %21 = vector.load %arg16[%c0_20, %c0_21] : memref<8x128xf32, #tpu.memory_space<vmem>>, vector<8x128xf32>
    %c0_22 = arith.constant 0 : index
    %c0_23 = arith.constant 0 : index
    %22 = vector.load %arg5[%c0_22, %c0_23] : memref<128x256xf32, #tpu.memory_space<vmem>>, vector<128x256xf32>
    %cst_24 = arith.constant dense<0.000000e+00> : vector<8x256xf32>
    %23 = tpu.matmul %21, %22, %cst_24 {dimension_numbers = #tpu.dot_dimension_numbers<[1], [0], [0], [1], [0, 0, 1, 1], [], []>} : vector<8x128xf32>, vector<128x256xf32>, vector<8x256xf32> -> vector<8x256xf32>
    %c0_25 = arith.constant 0 : index
    %c0_26 = arith.constant 0 : index
    %24 = vector.load %arg8[%c0_25, %c0_26] : memref<1x256xf32, #tpu.memory_space<vmem>>, vector<1x256xf32>
    %25 = vector.broadcast %24 : vector<1x256xf32> to vector<8x256xf32>
    %26 = arith.addf %23, %25 : vector<8x256xf32>
    %c0_27 = arith.constant 0 : index
    %c0_28 = arith.constant 0 : index
    %27 = vector.load %arg11[%c0_27, %c0_28] : memref<8x256xf32, #tpu.memory_space<vmem>>, vector<8x256xf32>
    tpu.vector_store %arg11[%c0_27, %c0_28], %26 {strides = array<i32>} : memref<8x256xf32, #tpu.memory_space<vmem>>, vector<8x256xf32>,
    %c0_i32_29 = arith.constant 0 : i32
    %28 = arith.cmpi eq, %arg0, %c0_i32_29 : i32
    %29 = arith.extui %28 : i1 to i32
    %c0_i32_30 = arith.constant 0 : i32
    %30 = arith.cmpi ne, %29, %c0_i32_30 : i32
    scf.if %30 {
      %c0_31 = arith.constant 0 : index
      %c0_32 = arith.constant 0 : index
      %31 = vector.load %arg12[%c0_31, %c0_32] : memref<1x128xf32, #tpu.memory_space<vmem>>, vector<1x128xf32>
      tpu.vector_store %arg12[%c0_31, %c0_32], %19 {strides = array<i32>} : memref<1x128xf32, #tpu.memory_space<vmem>>, vector<1x128xf32>,
      %c0_33 = arith.constant 0 : index
      %c0_34 = arith.constant 0 : index
      %32 = vector.load %arg5[%c0_33, %c0_34] : memref<128x256xf32, #tpu.memory_space<vmem>>, vector<128x256xf32>
      %cst_35 = arith.constant dense<0.000000e+00> : vector<1x256xf32>
      %33 = tpu.matmul %19, %32, %cst_35 {dimension_numbers = #tpu.dot_dimension_numbers<[1], [0], [0], [1], [0, 0, 1, 1], [], []>} : vector<1x128xf32>, vector<128x256xf32>, vector<1x256xf32> -> vector<1x256xf32>
      %c0_36 = arith.constant 0 : index
      %c0_37 = arith.constant 0 : index
      %34 = vector.load %arg8[%c0_36, %c0_37] : memref<1x256xf32, #tpu.memory_space<vmem>>, vector<1x256xf32>
      %35 = arith.addf %33, %34 : vector<1x256xf32>
      %c0_38 = arith.constant 0 : index
      %c0_39 = arith.constant 0 : index
      %36 = vector.load %arg13[%c0_38, %c0_39] : memref<1x256xf32, #tpu.memory_space<vmem>>, vector<1x256xf32>
      tpu.vector_store %arg13[%c0_38, %c0_39], %35 {strides = array<i32>} : memref<1x256xf32, #tpu.memory_space<vmem>>, vector<1x256xf32>,
    } else {
    }
    return
  }
  func.func @transform_0(%arg0: i32) -> (i32, i32) {
    %c0_i32 = arith.constant 0 : i32
    %c0_i32_0 = arith.constant 0 : i32
    return %arg0, %c0_i32 : i32, i32
  }
  func.func @transform_1(%arg0: i32) -> (i32, i32) {
    %c0_i32 = arith.constant 0 : i32
    %c0_i32_0 = arith.constant 0 : i32
    %c0_i32_1 = arith.constant 0 : i32
    return %c0_i32, %c0_i32_0 : i32, i32
  }
  func.func @transform_2(%arg0: i32) -> (i32, i32) {
    %c0_i32 = arith.constant 0 : i32
    %c0_i32_0 = arith.constant 0 : i32
    %c0_i32_1 = arith.constant 0 : i32
    return %c0_i32, %c0_i32_0 : i32, i32
  }
  func.func @transform_3(%arg0: i32) -> (i32, i32) {
    %c0_i32 = arith.constant 0 : i32
    %c0_i32_0 = arith.constant 0 : i32
    %c0_i32_1 = arith.constant 0 : i32
    return %c0_i32, %c0_i32_0 : i32, i32
  }
  func.func @transform_4(%arg0: i32) -> (i32, i32) {
    %c0_i32 = arith.constant 0 : i32
    %c0_i32_0 = arith.constant 0 : i32
    %c0_i32_1 = arith.constant 0 : i32
    return %c0_i32, %c0_i32_0 : i32, i32
  }
  func.func @transform_5(%arg0: i32) -> (i32, i32) {
    %c0_i32 = arith.constant 0 : i32
    %c0_i32_0 = arith.constant 0 : i32
    %c0_i32_1 = arith.constant 0 : i32
    return %c0_i32, %c0_i32_0 : i32, i32
  }
  func.func @transform_6(%arg0: i32) -> (i32, i32) {
    %c0_i32 = arith.constant 0 : i32
    %c0_i32_0 = arith.constant 0 : i32
    %c0_i32_1 = arith.constant 0 : i32
    return %c0_i32, %c0_i32_0 : i32, i32
  }
  func.func @transform_7(%arg0: i32) -> (i32, i32) {
    %c0_i32 = arith.constant 0 : i32
    %c0_i32_0 = arith.constant 0 : i32
    %c0_i32_1 = arith.constant 0 : i32
    return %c0_i32, %c0_i32_0 : i32, i32
  }
  func.func @transform_8(%arg0: i32) -> (i32, i32) {
    %c0_i32 = arith.constant 0 : i32
    %c0_i32_0 = arith.constant 0 : i32
    %c0_i32_1 = arith.constant 0 : i32
    return %c0_i32, %c0_i32_0 : i32, i32
  }
  func.func @transform_9(%arg0: i32) -> (i32, i32) {
    %c0_i32 = arith.constant 0 : i32
    %c0_i32_0 = arith.constant 0 : i32
    %c0_i32_1 = arith.constant 0 : i32
    return %c0_i32, %c0_i32_0 : i32, i32
  }
  func.func @transform_10(%arg0: i32) -> (i32, i32) {
    %c0_i32 = arith.constant 0 : i32
    %c0_i32_0 = arith.constant 0 : i32
    return %arg0, %c0_i32 : i32, i32
  }
  func.func @transform_11(%arg0: i32) -> (i32, i32) {
    %c0_i32 = arith.constant 0 : i32
    %c0_i32_0 = arith.constant 0 : i32
    %c0_i32_1 = arith.constant 0 : i32
    return %c0_i32, %c0_i32_0 : i32, i32
  }
  func.func @transform_12(%arg0: i32) -> (i32, i32) {
    %c0_i32 = arith.constant 0 : i32
    %c0_i32_0 = arith.constant 0 : i32
    %c0_i32_1 = arith.constant 0 : i32
    return %c0_i32, %c0_i32_0 : i32, i32
  }
}

</mosaic_0001>

<bundles_post_ra>
// kernel: tpu_custom_call.1
= control target key start
LH: loop header
LB: loop body
LE: loop exit
PB: predicated region body
PF: predicated region fallthrough
CT: control target
= control target key end

     0   :  { %18 = vsyncpa [#allocation6], 0  ;;  %s1522_s0 = inlined_call_operand.hbm [shape: f32[8,128], index: 0, kind: input, shape index: {}]   ;;  %s1523_s1 = inlined_call_operand.hbm [shape: f32[128,384], index: 1, kind: input, shape index: {}]   ;;  %s1524_s2 = inlined_call_operand.hbm [shape: f32[128,768], index: 2, kind: input, shape index: {}]   ;;  %s1525_s3 = inlined_call_operand.hbm [shape: f32[128,384], index: 3, kind: input, shape index: {}]   ;;  %s1526_s4 = inlined_call_operand.hbm [shape: f32[128,256], index: 4, kind: input, shape index: {}]   ;;  %s1527_s5 = inlined_call_operand.vmem [shape: f32[1,384], index: 5, kind: input, shape index: {}]   ;;  %s1528_s6 = inlined_call_operand.hbm [shape: f32[1,384], index: 6, kind: input, shape index: {}]   ;;  %s1529_s7 = inlined_call_operand.hbm [shape: f32[1,256], index: 7, kind: input, shape index: {}]   ;;  %s1530_s8 = inlined_call_operand.vmem [shape: f32[1,384], index: 8, kind: input, shape index: {}]   ;;  %s1531_s9 = inlined_call_operand.vmem [shape: f32[1,128], index: 9, kind: input, shape index: {}]   ;;  %s1532_s10 = inlined_call_operand.hbm [shape: f32[8,256], index: 10, kind: output, shape index: {0}]   ;;  %s1533_s11 = inlined_call_operand.hbm [shape: f32[1,128], index: 11, kind: output, shape index: {1}]   ;;  %s1534_s12 = inlined_call_operand.hbm [shape: f32[1,256], index: 12, kind: output, shape index: {2}]  }
   0x1   :  { %19 = vsyncpa [#allocation9], 0 }
   0x2   :  { %20 = vsyncpa [#allocation12], 0 }
   0x3   :  { %21 = vsyncpa [#allocation15], 0 }
   0x4   :  { %22 = vsyncpa [#allocation7], 0  ;;  %s39_s23 = sshll.u32 %s1523_s1, 4  ;;  %s40_s23 = int_to_ptr.hbm [resolvable:$true] %s39_s23 }
   0x5   :  { %23 = vsyncpa [#allocation19], 0  ;;  %s1331_s24 = smov [#allocation8]   ;;  %s65_s28 = sshll.u32 %s1525_s3, 4  ;;  %s66_s28 = int_to_ptr.hbm [resolvable:$true] %s65_s28 }
   0x6   :  { %s41_s25 = sshll.u32 %s1331_s24, 4  ;;  %s1332_s29 = smov 384   ;;  %s42_s25 = int_to_ptr.vmem [resolvable:$true] %s41_s25 }
   0x7   :  { %s1333_s30 = smov 24   ;;  %s1334_s13 = smov [#allocation11]  }
   0x8   :  { %47 = dma.hbm_to_vmem [thread:$0]  %s40_s23, 6144, %s42_s25, [#allocation9], %s1332_s29, %s1332_s29, %s1333_s30  }
   0x9   :  { %s67_s14 = sshll.u32 %s1334_s13, 4  ;;  %s94_s17 = sshll.u32 %s1528_s6, 4  ;;  %s68_s14 = int_to_ptr.vmem [resolvable:$true] %s67_s14  ;;  %s95_s17 = int_to_ptr.hbm [resolvable:$true] %s94_s17 }
   0xa   :  { %73 = dma.hbm_to_vmem [thread:$0]  %s66_s28, 6144, %s68_s14, [#allocation12], %s1332_s29, %s1332_s29, %s1333_s30  }
   0xb   :  { %s29_s19 = sshll.u32 %s1522_s0, 4  ;;  %s1335_s20 = smov [#allocation14]   ;;  %s30_s19 = int_to_ptr.hbm [resolvable:$true] %s29_s19 }
   0xc   :  { %s96_s21 = sshll.u32 %s1335_s20, 4  ;;  %s1336_s3 = smov [#allocation5]   ;;  %s97_s21 = int_to_ptr.vmem [resolvable:$true] %s96_s21 }
   0xd   :  { %99 = dma.hbm_to_vmem [thread:$0]  %s95_s17, 48, %s97_s21, [#allocation15]  }
   0xe   :  { %s31_s22 = sshll.u32 %s1336_s3, 4  ;;  %s52_s25 = sshll.u32 %s1524_s2, 4  ;;  %s32_s22 = int_to_ptr.vmem [resolvable:$true] %s31_s22  ;;  %s53_s25 = int_to_ptr.hbm [resolvable:$true] %s52_s25 }
   0xf   :  { %34 = dma.hbm_to_vmem [thread:$0]  %s30_s19, 128, %s32_s22, [#allocation6]  }
  0x10   :  { %s1337_s6 = smov [#allocation10]   ;;  %s78_s0 = sshll.u32 %s1526_s4, 4  ;;  %s79_s0 = int_to_ptr.hbm [resolvable:$true] %s78_s0 }
  0x11   :  { %s54_s26 = sshll.u32 %s1337_s6, 4  ;;  %s1338_s29 = smov 768   ;;  %s55_s26 = int_to_ptr.vmem [resolvable:$true] %s54_s26 }
  0x12   :  { %s1339_s30 = smov 48   ;;  %s1340_s13 = smov [#allocation13]  }
  0x13   :  { %60 = dma.hbm_to_vmem [thread:$0]  %s53_s25, 12288, %s55_s26, [#allocation9], %s1338_s29, %s1338_s29, %s1339_s30  }
  0x14   :  { %s80_s14 = sshll.u32 %s1340_s13, 4  ;;  %s1341_s15 = smov 256   ;;  %s81_s14 = int_to_ptr.vmem [resolvable:$true] %s80_s14 }
  0x15   :  { %s1342_s16 = smov 16   ;;  %s105_s1 = sshll.u32 %s1529_s7, 4  ;;  %s106_s1 = int_to_ptr.hbm [resolvable:$true] %s105_s1 }
  0x16   :  { %86 = dma.hbm_to_vmem [thread:$0]  %s79_s0, 4096, %s81_s14, [#allocation12], %s1341_s15, %s1341_s15, %s1342_s16  }
  0x17   :  { %s1343_s18 = smov [#allocation16]  }
  0x18   :  { %s107_s19 = sshll.u32 %s1343_s18, 4  ;;  %s108_s19 = int_to_ptr.vmem [resolvable:$true] %s107_s19 }
  0x19   :  { %110 = dma.hbm_to_vmem [thread:$0]  %s106_s1, 32, %s108_s19, [#allocation15]  }
  0x1a   :  { %1311 = dma.done.wait [#allocation6], 128  }
  0x1b   :  { %1312 = vsyncadd [#allocation6], 4294967168 }
  0x1c   :  { %1313 = dma.done.wait [#allocation9], 18432  }
  0x1d   :  { %1314 = vsyncadd [#allocation9], 4294948864 }
  0x1e   :  { %1315 = dma.done.wait [#allocation12], 10240  }
  0x1f   :  { %1316 = vsyncadd [#allocation12], 4294957056 }
  0x20   :  { %1317 = dma.done.wait [#allocation15], 80  }
  0x21   :  { %1318 = vsyncadd [#allocation15], 4294967216  ;;  %v147_v0 = vld [vmem:[%s1531_s9] sm:$0x1]  ;;  %v1436_v1 = vld [vmem:[#allocation14] sm:$0x7]  ;;  %v275_v62 = vlaneseq }
  0x22   :  { %v197_v2 = vld [vmem:[#allocation8 + $0x178] sm:$0xff]  ;;  %148 = vst [vmem:[#allocation2] sm:$0x1] %v147_v0  ;;  %v194_v3 = vld [vmem:[#allocation8 + $0x160] sm:$0xff]  ;;  %v195_v4 = vld [vmem:[#allocation8 + $0x168] sm:$0xff] }
  0x23   :  { %246 = vmatpush.msra.mxu2 %v197_v2  ;;  %v191_v5 = vld [vmem:[#allocation8 + $0x148] sm:$0xff]  ;;  %206 = vmatpush.msra.mxu0 %v195_v4  ;;  %v196_v6 = vld [vmem:[#allocation8 + $0x170] sm:$0xff]  ;;  %v193_v8 = vld [vmem:[#allocation8 + $0x158] sm:$0xff]  ;;  %vm277_vm0 = vcmp.lt.s32.totalorder %v275_v62, 384 }
  0x24   :  { %v192_v7 = vld [vmem:[#allocation8 + $0x150] sm:$0xff]  ;;  %226 = vmatpush.msra.mxu1 %v196_v6  ;;  %v189_v9 = vld [vmem:[#allocation8 + $0x138] sm:$0xff]  ;;  %v190_v11 = vld [vmem:[#allocation8 + $0x140] sm:$0xff] }
  0x25   :  { %247 = vmatpush.msra.mxu2 %v194_v3  ;;  %v188_v10 = vld [vmem:[#allocation8 + $0x130] sm:$0xff]  ;;  %207 = vmatpush.msra.mxu0 %v192_v7  ;;  %v186_v12 = vld [vmem:[#allocation8 + $0x120] sm:$0xff]  ;;  %v185_v13 = vld [vmem:[#allocation8 + $0x118] sm:$0xff] }
  0x26   :  { %227 = vmatpush.msra.mxu1 %v193_v8  ;;  %v187_v14 = vld [vmem:[#allocation8 + $0x128] sm:$0xff]  ;;  %v182_v17 = vld [vmem:[#allocation8 + $0x100] sm:$0xff]  ;;  %v184_v18 = vld [vmem:[#allocation8 + $0x110] sm:$0xff] }
  0x27   :  { %248 = vmatpush.msra.mxu2 %v191_v5  ;;  %208 = vmatpush.msra.mxu0 %v189_v9  ;;  %v183_v15 = vld [vmem:[#allocation8 + $0x108] sm:$0xff]  ;;  %v180_v19 = vld [vmem:[#allocation8 + $0xf0] sm:$0xff]  ;;  %v181_v21 = vld [vmem:[#allocation8 + $0xf8] sm:$0xff] }
  0x28   :  { %228 = vmatpush.msra.mxu1 %v190_v11  ;;  %v179_v20 = vld [vmem:[#allocation8 + $0xe8] sm:$0xff]  ;;  %v177_v22 = vld [vmem:[#allocation8 + $0xd8] sm:$0xff]  ;;  %v176_v23 = vld [vmem:[#allocation8 + $0xd0] sm:$0xff] }
  0x29   :  { %249 = vmatpush.msra.mxu2 %v188_v10  ;;  %v1438_v16 = vld [vmem:[#allocation2] sm:$0x1]   ;;  %209 = vmatpush.msra.mxu0 %v186_v12  ;;  %v178_v24 = vld [vmem:[#allocation8 + $0xe0] sm:$0xff]  ;;  %v173_v26 = vld [vmem:[#allocation8 + $0xb8] sm:$0xff] }
  0x2a   :  { %229 = vmatpush.msra.mxu1 %v187_v14  ;;  %v174_v25 = vld [vmem:[#allocation8 + $0xc0] sm:$0xff]  ;;  %v175_v27 = vld [vmem:[#allocation8 + $0xc8] sm:$0xff]  ;;  %v172_v30 = vld [vmem:[#allocation8 + $0xb0] sm:$0xff] }
  0x2b   :  { %250 = vmatpush.msra.mxu2 %v185_v13  ;;  %210 = vmatpush.msra.mxu0 %v183_v15  ;;  %v171_v28 = vld [vmem:[#allocation8 + $0xa8] sm:$0xff]  ;;  %v170_v29 = vld [vmem:[#allocation8 + $0xa0] sm:$0xff]  ;;  %v168_v31 = vld [vmem:[#allocation8 + $0x90] sm:$0xff] }
  0x2c   :  { %230 = vmatpush.msra.mxu1 %v184_v18  ;;  %v167_v32 = vld [vmem:[#allocation8 + $0x88] sm:$0xff]  ;;  %v169_v33 = vld [vmem:[#allocation8 + $0x98] sm:$0xff]  ;;  %v164_v35 = vld [vmem:[#allocation8 + $0x70] sm:$0xff] }
  0x2d   :  { %251 = vmatpush.msra.mxu2 %v182_v17  ;;  %211 = vmatpush.msra.mxu0 %v180_v19  ;;  %v165_v34 = vld [vmem:[#allocation8 + $0x78] sm:$0xff]  ;;  %v166_v36 = vld [vmem:[#allocation8 + $0x80] sm:$0xff]  ;;  %v163_v39 = vld [vmem:[#allocation8 + $0x68] sm:$0xff] }
  0x2e   :  { %231 = vmatpush.msra.mxu1 %v181_v21  ;;  %v162_v37 = vld [vmem:[#allocation8 + $0x60] sm:$0xff]  ;;  %v161_v38 = vld [vmem:[#allocation8 + $0x58] sm:$0xff]  ;;  %v159_v40 = vld [vmem:[#allocation8 + $0x48] sm:$0xff] }
  0x2f   :  { %252 = vmatpush.msra.mxu2 %v179_v20  ;;  %212 = vmatpush.msra.mxu0 %v177_v22  ;;  %v158_v41 = vld [vmem:[#allocation8 + $0x40] sm:$0xff]  ;;  %v160_v42 = vld [vmem:[#allocation8 + $0x50] sm:$0xff]  ;;  %v155_v44 = vld [vmem:[#allocation8 + $0x28] sm:$0xff] }
  0x30   :  { %232 = vmatpush.msra.mxu1 %v178_v24  ;;  %v156_v43 = vld [vmem:[#allocation8 + $0x30] sm:$0xff]  ;;  %v157_v45 = vld [vmem:[#allocation8 + $0x38] sm:$0xff]  ;;  %v154_v48 = vld [vmem:[#allocation8 + $0x20] sm:$0xff] }
  0x31   :  { %253 = vmatpush.msra.mxu2 %v176_v23  ;;  %213 = vmatpush.msra.mxu0 %v174_v25  ;;  %v153_v46 = vld [vmem:[#allocation8 + $0x18] sm:$0xff]  ;;  %v152_v47 = vld [vmem:[#allocation8 + $0x10] sm:$0xff]  ;;  %v150_v50 = vld [vmem:[#allocation8] sm:$0xff] }
  0x32   :  { %233 = vmatpush.msra.mxu1 %v175_v27  ;;  %v149_v49 = vld [vmem:[#allocation5] sm:$0xff]  ;;  %v151_v51 = vld [vmem:[#allocation8 + $0x8] sm:$0xff] }
  0x33   :  { %254 = vmatpush.msra.mxu2 %v173_v26  ;;  %214 = vmatpush.msra.mxu0 %v171_v28  ;;  %v198_v52 = vld [vmem:[%s1527_s5] sm:$0x7]  ;;  %s1450_s5 = smov 0  }
  0x34   :  { %234 = vmatpush.msra.mxu1 %v172_v30  ;;  %v200_v53 = vperm.slane %v198_v52, 0  ;;  %v201_v54 = vperm.slane %v198_v52, 1  ;;  %v202_v59 = vperm.slane %v198_v52, 2  ;;  %v273_v63 = vld [vmem:[%s1530_s8] sm:$0x7] }
  0x35   :  { %255 = vmatpush.msra.mxu2 %v170_v29  ;;  %215 = vmatpush.msra.mxu0 %v168_v31 }
  0x36   :  { %235 = vmatpush.msra.mxu1 %v169_v33 }
  0x37   :  { %256 = vmatpush.msra.mxu2 %v167_v32  ;;  %216 = vmatpush.msra.mxu0 %v165_v34 }
  0x38   :  { %236 = vmatpush.msra.mxu1 %v166_v36 }
  0x39   :  { %257 = vmatpush.msra.mxu2 %v164_v35  ;;  %217 = vmatpush.msra.mxu0 %v162_v37 }
  0x3a   :  { %237 = vmatpush.msra.mxu1 %v163_v39 }
  0x3b   :  { %258 = vmatpush.msra.mxu2 %v161_v38  ;;  %218 = vmatpush.msra.mxu0 %v159_v40 }
  0x3c   :  { %238 = vmatpush.msra.mxu1 %v160_v42 }
  0x3d   :  { %259 = vmatpush.msra.mxu2 %v158_v41  ;;  %219 = vmatpush.msra.mxu0 %v156_v43 }
  0x3e   :  { %239 = vmatpush.msra.mxu1 %v157_v45 }
  0x3f   :  { %260 = vmatpush.msra.mxu2 %v155_v44  ;;  %220 = vmatpush.msra.mxu0 %v153_v46 }
  0x40   :  { %240 = vmatpush.msra.mxu1 %v154_v48 }
  0x41   :  { %261 = vmatpush.msra.mxu2 %v152_v47  ;;  %221 = vmatpush.msra.mxu0 %v150_v50 }
  0x42   :  { %262 = vmatmul.f32.vlgmr.msra.gmra.mxu2 %v149_v49  ;;  %241 = vmatpush.msra.mxu1 %v151_v51 }
  0x43   :  { %222 = vmatmul.f32.vlgmr.msra.gmra.mxu0 %v149_v49  ;;  %242 = vmatmul.f32.vlgmr.msra.gmra.mxu1 %v149_v49 }
  0xc0   :  { %v223_v55 = vpop.f32.mrf.mxu0  ;;  %v243_v57 = vpop.f32.mrf.mxu1 }
  0xc1   :  { %v224_v56 = vadd.f32 %v223_v55, %v200_v53  ;;  %v244_v58 = vadd.f32 %v243_v57, %v201_v54 }
  0xc3   :  { %266 = vst [vmem:[#allocation3] sm:$0xff] %v224_v56 }
  0xc4   :  { %267 = vst [vmem:[#allocation3 + $0x8] sm:$0xff] %v244_v58 }
  0xc5   :  { %v263_v60 = vpop.f32.mrf.mxu2 }
  0xc6   :  { %v264_v61 = vadd.f32 %v263_v60, %v202_v59 }
  0xc8   :  { %268 = vst [vmem:[#allocation3 + $0x10] sm:$0xff] %v264_v61 }
  0xcf   :  { %v272_v0 = vld [vmem:[#allocation3] ss:$8 sm:$0x7] }
  0xd0   :  { %v274_v2 = vadd.f32 %v273_v63, %v272_v0 }
  0xd2   :  { %279 = vst.msk [vmem:[#allocation3] ss:$8 sm:$0x7] %vm277_vm0, %v274_v2 }
  0xd3 LB: > { %v384_v3 = vld [vmem:[#allocation10 + $0x2d0] sm:$0xff]  ;;  %v385_v4 = vld [vmem:[#allocation10 + $0x2d8] sm:$0xff]  ;;  %v378_v5 = vld [vmem:[#allocation10 + $0x2a0] sm:$0xff]  ;;  %s520_s8 = sshra.s32 %s1329_s5, 3  ;;  %s523_s23 = sand.u32 7, %s1329_s5  ;;  %vm534_vm1 = vcmask 1040384   ;;  %s1329_s5 = sphi %s1450_s5, %s292_s5   ;;  %v1325_v16 = vphi %v1438_v16, %v1536_v16  }
  0xd4   : > { %390 = vmatpush.msra.mxu0 %v384_v3  ;;  %410 = vmatpush.msra.mxu1 %v385_v4  ;;  %v379_v6 = vld [vmem:[#allocation10 + $0x2a8] sm:$0xff]  ;;  %v372_v7 = vld [vmem:[#allocation10 + $0x270] sm:$0xff]  ;;  %v373_v8 = vld [vmem:[#allocation10 + $0x278] sm:$0xff]  ;;  %s1006_s22 = smul.u32 24, %s520_s8  ;;  %vm536_vm2 = vcmask 1041408   ;;  %p763_p0 = scmp.lt.s32.totalorder %s1329_s5, 5 }
  0xd5   : > { %v366_v9 = vld [vmem:[#allocation10 + $0x240] sm:$0xff]  ;;  %v367_v10 = vld [vmem:[#allocation10 + $0x248] sm:$0xff]  ;;  %v360_v11 = vld [vmem:[#allocation10 + $0x210] sm:$0xff]  ;;  %s761_s26 = scalar_lea.vmem [#allocation4], %s1329_s5  ;;  %s292_s5 = sadd.s32 1, %s1329_s5  }
  0xd6   : > { %391 = vmatpush.msra.mxu0 %v378_v5  ;;  %411 = vmatpush.msra.mxu1 %v379_v6  ;;  %v361_v12 = vld [vmem:[#allocation10 + $0x218] sm:$0xff]  ;;  %v354_v13 = vld [vmem:[#allocation10 + $0x1e0] sm:$0xff]  ;;  %v355_v14 = vld [vmem:[#allocation10 + $0x1e8] sm:$0xff]  ;;  %s526_s24 = sadd.s32 %s1006_s22, %s523_s23  ;;  %p289_p1 = scmp.ge.s32.totalorder %s292_s5, 8  }
  0xd7   : > { %v387_v15 = vld [vmem:[#allocation10 + $0x2e8] sm:$0xff]  ;;  %v348_v17 = vld [vmem:[#allocation10 + $0x1b0] sm:$0xff]  ;;  %v349_v18 = vld [vmem:[#allocation10 + $0x1b8] sm:$0xff]  ;;  %s527_s25 = scalar_lea.vmem [#allocation3], %s526_s24  ;;  %s1344_s27 = smov (%p289_p1), [#allocation18]  }
  0xd8   : > { %392 = vmatpush.msra.mxu0 %v372_v7  ;;  %412 = vmatpush.msra.mxu1 %v373_v8  ;;  %v381_v19 = vld [vmem:[#allocation10 + $0x2b8] sm:$0xff]  ;;  %v375_v20 = vld [vmem:[#allocation10 + $0x288] sm:$0xff]  ;;  %v342_v21 = vld [vmem:[#allocation10 + $0x180] sm:$0xff]  ;;  %s764_s6 = scalar_select %p763_p0, 1, 0 }
  0xd9   : > { %450 = vmatpush.msra.mxu3 %v387_v15  ;;  %v343_v22 = vld [vmem:[#allocation10 + $0x188] sm:$0xff]  ;;  %v369_v23 = vld [vmem:[#allocation10 + $0x258] sm:$0xff]  ;;  %v336_v24 = vld [vmem:[#allocation10 + $0x150] sm:$0xff]  ;;  %s959_s28 = sshll.u32 (%p289_p1), %s1344_s27, 4  ;;  %s961_s30 = sshll.u32 (%p289_p1), %s1533_s11, 4  ;;  %s960_s28 = int_to_ptr.vmem [resolvable:$true] %s959_s28  ;;  %s962_s30 = int_to_ptr.hbm [resolvable:$true] %s961_s30 }
  0xda   : > { %393 = vmatpush.msra.mxu0 %v366_v9  ;;  %413 = vmatpush.msra.mxu1 %v367_v10  ;;  %v337_v25 = vld [vmem:[#allocation10 + $0x158] sm:$0xff]  ;;  %v363_v26 = vld [vmem:[#allocation10 + $0x228] sm:$0xff]  ;;  %v330_v27 = vld [vmem:[#allocation10 + $0x120] sm:$0xff]  ;;  %s1345_s13 = smov (%p289_p1), [#allocation17]   ;;  %s950_s2 = sshll.u32 (%p289_p1), %s1532_s10, 4  ;;  %s951_s2 = int_to_ptr.hbm [resolvable:$true] %s950_s2 }
  0xdb   : > { %451 = vmatpush.msra.mxu3 %v381_v19  ;;  %v331_v28 = vld [vmem:[#allocation10 + $0x128] sm:$0xff]  ;;  %v357_v29 = vld [vmem:[#allocation10 + $0x1f8] sm:$0xff]  ;;  %v324_v30 = vld [vmem:[#allocation10 + $0xf0] sm:$0xff]  ;;  %s948_s14 = sshll.u32 (%p289_p1), %s1345_s13, 4  ;;  %s1346_s11 = smov (%p289_p1), [#allocation20]   ;;  %s949_s14 = int_to_ptr.vmem [resolvable:$true] %s948_s14 }
  0xdc   : > { %394 = vmatpush.msra.mxu0 %v360_v11  ;;  %414 = vmatpush.msra.mxu1 %v361_v12  ;;  %v325_v31 = vld [vmem:[#allocation10 + $0xf8] sm:$0xff]  ;;  %v351_v32 = vld [vmem:[#allocation10 + $0x1c8] sm:$0xff]  ;;  %v318_v33 = vld [vmem:[#allocation10 + $0xc0] sm:$0xff]  ;;  %s970_s17 = sshll.u32 (%p289_p1), %s1346_s11, 4  ;;  %s972_s19 = sshll.u32 (%p289_p1), %s1534_s12, 4  ;;  %s971_s17 = int_to_ptr.vmem [resolvable:$true] %s970_s17  ;;  %s973_s19 = int_to_ptr.hbm [resolvable:$true] %s972_s19 }
  0xdd   : > { %452 = vmatpush.msra.mxu3 %v375_v20  ;;  %v319_v34 = vld [vmem:[#allocation10 + $0xc8] sm:$0xff]  ;;  %v345_v35 = vld [vmem:[#allocation10 + $0x198] sm:$0xff]  ;;  %v312_v36 = vld [vmem:[#allocation10 + $0x90] sm:$0xff] }
  0xde   : > { %395 = vmatpush.msra.mxu0 %v354_v13  ;;  %415 = vmatpush.msra.mxu1 %v355_v14  ;;  %v313_v37 = vld [vmem:[#allocation10 + $0x98] sm:$0xff]  ;;  %v339_v38 = vld [vmem:[#allocation10 + $0x168] sm:$0xff]  ;;  %v306_v39 = vld [vmem:[#allocation10 + $0x60] sm:$0xff] }
  0xdf   : > { %453 = vmatpush.msra.mxu3 %v369_v23  ;;  %v307_v40 = vld [vmem:[#allocation10 + $0x68] sm:$0xff]  ;;  %v333_v41 = vld [vmem:[#allocation10 + $0x138] sm:$0xff]  ;;  %v300_v42 = vld [vmem:[#allocation10 + $0x30] sm:$0xff] }
  0xe0   : > { %396 = vmatpush.msra.mxu0 %v348_v17  ;;  %416 = vmatpush.msra.mxu1 %v349_v18  ;;  %v301_v43 = vld [vmem:[#allocation10 + $0x38] sm:$0xff]  ;;  %v386_v44 = vld [vmem:[#allocation10 + $0x2e0] sm:$0xff]  ;;  %v327_v45 = vld [vmem:[#allocation10 + $0x108] sm:$0xff] }
  0xe1   : > { %454 = vmatpush.msra.mxu3 %v363_v26  ;;  %v294_v46 = vld [vmem:[#allocation10] sm:$0xff]  ;;  %v295_v47 = vld [vmem:[#allocation10 + $0x8] sm:$0xff]  ;;  %430 = vmatpush.msra.mxu2 %v386_v44  ;;  %v380_v48 = vld [vmem:[#allocation10 + $0x2b0] sm:$0xff] }
  0xe2   : > { %397 = vmatpush.msra.mxu0 %v342_v21  ;;  %417 = vmatpush.msra.mxu1 %v343_v22  ;;  %v388_v49 = vld [vmem:[#allocation10 + $0x2f0] sm:$0xff]  ;;  %v389_v50 = vld [vmem:[#allocation10 + $0x2f8] sm:$0xff]  ;;  %v382_v52 = vld [vmem:[#allocation10 + $0x2c0] sm:$0xff] }
  0xe3   : > { %455 = vmatpush.msra.mxu3 %v357_v29  ;;  %v321_v51 = vld [vmem:[#allocation10 + $0xd8] sm:$0xff]  ;;  %431 = vmatpush.msra.mxu2 %v380_v48  ;;  %v383_v53 = vld [vmem:[#allocation10 + $0x2c8] sm:$0xff]  ;;  %v376_v55 = vld [vmem:[#allocation10 + $0x290] sm:$0xff] }
  0xe4   : > { %398 = vmatpush.msra.mxu0 %v336_v24  ;;  %418 = vmatpush.msra.mxu1 %v337_v25  ;;  %v315_v54 = vld [vmem:[#allocation10 + $0xa8] sm:$0xff]  ;;  %v377_v56 = vld [vmem:[#allocation10 + $0x298] sm:$0xff]  ;;  %v374_v58 = vld [vmem:[#allocation10 + $0x280] sm:$0xff] }
  0xe5   : > { %456 = vmatpush.msra.mxu3 %v351_v32  ;;  %v309_v57 = vld [vmem:[#allocation10 + $0x78] sm:$0xff]  ;;  %v370_v59 = vld [vmem:[#allocation10 + $0x260] sm:$0xff]  ;;  %v371_v60 = vld [vmem:[#allocation10 + $0x268] sm:$0xff]  ;;  %432 = vmatpush.msra.mxu2 %v374_v58 }
  0xe6   : > { %399 = vmatpush.msra.mxu0 %v330_v27  ;;  %419 = vmatpush.msra.mxu1 %v331_v28  ;;  %v303_v61 = vld [vmem:[#allocation10 + $0x48] sm:$0xff]  ;;  %v368_v63 = vld [vmem:[#allocation10 + $0x250] sm:$0xff]  ;;  %v365_v2 = vld [vmem:[#allocation10 + $0x238] sm:$0xff] }
  0xe7   : > { %457 = vmatpush.msra.mxu3 %v345_v35  ;;  %v364_v0 = vld [vmem:[#allocation10 + $0x230] sm:$0xff]  ;;  %v297_v3 = vld [vmem:[#allocation10 + $0x18] sm:$0xff]  ;;  %v362_v4 = vld [vmem:[#allocation10 + $0x220] sm:$0xff]  ;;  %433 = vmatpush.msra.mxu2 %v368_v63 }
  0xe8   : > { %400 = vmatpush.msra.mxu0 %v324_v30  ;;  %420 = vmatpush.msra.mxu1 %v325_v31  ;;  %v358_v5 = vld [vmem:[#allocation10 + $0x200] sm:$0xff]  ;;  %v359_v6 = vld [vmem:[#allocation10 + $0x208] sm:$0xff]  ;;  %v356_v7 = vld [vmem:[#allocation10 + $0x1f0] sm:$0xff] }
  0xe9   : > { %458 = vmatpush.msra.mxu3 %v339_v38  ;;  %v352_v8 = vld [vmem:[#allocation10 + $0x1d0] sm:$0xff]  ;;  %v353_v9 = vld [vmem:[#allocation10 + $0x1d8] sm:$0xff]  ;;  %434 = vmatpush.msra.mxu2 %v362_v4  ;;  %v350_v10 = vld [vmem:[#allocation10 + $0x1c0] sm:$0xff] }
  0xea   : > { %401 = vmatpush.msra.mxu0 %v318_v33  ;;  %421 = vmatpush.msra.mxu1 %v319_v34  ;;  %v346_v11 = vld [vmem:[#allocation10 + $0x1a0] sm:$0xff]  ;;  %v347_v12 = vld [vmem:[#allocation10 + $0x1a8] sm:$0xff]  ;;  %v344_v13 = vld [vmem:[#allocation10 + $0x190] sm:$0xff] }
  0xeb   : > { %459 = vmatpush.msra.mxu3 %v333_v41  ;;  %435 = vmatpush.msra.mxu2 %v356_v7  ;;  %v340_v14 = vld [vmem:[#allocation10 + $0x170] sm:$0xff]  ;;  %v341_v15 = vld [vmem:[#allocation10 + $0x178] sm:$0xff]  ;;  %v338_v17 = vld [vmem:[#allocation10 + $0x160] sm:$0xff]  ;;  %v512_v7 = vperm.slane %v1436_v1, 1 }
  0xec   : > { %402 = vmatpush.msra.mxu0 %v312_v36  ;;  %422 = vmatpush.msra.mxu1 %v313_v37  ;;  %v334_v18 = vld [vmem:[#allocation10 + $0x140] sm:$0xff]  ;;  %v335_v19 = vld [vmem:[#allocation10 + $0x148] sm:$0xff]  ;;  %v332_v20 = vld [vmem:[#allocation10 + $0x130] sm:$0xff] }
  0xed   : > { %460 = vmatpush.msra.mxu3 %v327_v45  ;;  %436 = vmatpush.msra.mxu2 %v350_v10  ;;  %v328_v21 = vld [vmem:[#allocation10 + $0x110] sm:$0xff]  ;;  %v329_v22 = vld [vmem:[#allocation10 + $0x118] sm:$0xff]  ;;  %v326_v23 = vld [vmem:[#allocation10 + $0x100] sm:$0xff] }
  0xee   : > { %403 = vmatpush.msra.mxu0 %v306_v39  ;;  %423 = vmatpush.msra.mxu1 %v307_v40  ;;  %v322_v24 = vld [vmem:[#allocation10 + $0xe0] sm:$0xff]  ;;  %v323_v25 = vld [vmem:[#allocation10 + $0xe8] sm:$0xff]  ;;  %v320_v26 = vld [vmem:[#allocation10 + $0xd0] sm:$0xff] }
  0xef   : > { %461 = vmatpush.msra.mxu3 %v321_v51  ;;  %437 = vmatpush.msra.mxu2 %v344_v13  ;;  %v316_v27 = vld [vmem:[#allocation10 + $0xb0] sm:$0xff]  ;;  %v317_v28 = vld [vmem:[#allocation10 + $0xb8] sm:$0xff]  ;;  %v314_v29 = vld [vmem:[#allocation10 + $0xa0] sm:$0xff] }
  0xf0   : > { %404 = vmatpush.msra.mxu0 %v300_v42  ;;  %424 = vmatpush.msra.mxu1 %v301_v43  ;;  %v310_v30 = vld [vmem:[#allocation10 + $0x80] sm:$0xff]  ;;  %v311_v31 = vld [vmem:[#allocation10 + $0x88] sm:$0xff]  ;;  %v308_v32 = vld [vmem:[#allocation10 + $0x70] sm:$0xff] }
  0xf1   : > { %462 = vmatpush.msra.mxu3 %v315_v54  ;;  %438 = vmatpush.msra.mxu2 %v338_v17  ;;  %v304_v33 = vld [vmem:[#allocation10 + $0x50] sm:$0xff]  ;;  %v305_v34 = vld [vmem:[#allocation10 + $0x58] sm:$0xff]  ;;  %v302_v35 = vld [vmem:[#allocation10 + $0x40] sm:$0xff] }
  0xf2   : > { %405 = vmatpush.msra.mxu0 %v294_v46  ;;  %425 = vmatpush.msra.mxu1 %v295_v47  ;;  %v298_v36 = vld [vmem:[#allocation10 + $0x20] sm:$0xff]  ;;  %v299_v37 = vld [vmem:[#allocation10 + $0x28] sm:$0xff]  ;;  %v296_v38 = vld [vmem:[#allocation10 + $0x10] sm:$0xff] }
  0xf3   : > { %406 = vmatmul.f32.vlgmr.msra.gmra.mxu0 %v1325_v16  ;;  %426 = vmatmul.f32.vlgmr.msra.gmra.mxu1 %v1325_v16  ;;  %v637_v39 = vld [vmem:[#allocation11 + $0x168] sm:$0xff]  ;;  %v638_v40 = vld [vmem:[#allocation11 + $0x170] sm:$0xff]  ;;  %v639_v41 = vld [vmem:[#allocation11 + $0x178] sm:$0xff] }
  0xf4   : > { %470 = vmatpush.msrb.mxu0 %v388_v49  ;;  %490 = vmatpush.msrb.mxu1 %v389_v50  ;;  %v634_v44 = vld [vmem:[#allocation11 + $0x150] sm:$0xff]  ;;  %v635_v45 = vld [vmem:[#allocation11 + $0x158] sm:$0xff]  ;;  %v636_v46 = vld [vmem:[#allocation11 + $0x160] sm:$0xff] }
  0xf5   : > { %463 = vmatpush.msra.mxu3 %v309_v57  ;;  %439 = vmatpush.msra.mxu2 %v332_v20  ;;  %v631_v47 = vld [vmem:[#allocation11 + $0x138] sm:$0xff]  ;;  %v632_v48 = vld [vmem:[#allocation11 + $0x140] sm:$0xff]  ;;  %v633_v49 = vld [vmem:[#allocation11 + $0x148] sm:$0xff] }
  0xf6   : > { %471 = vmatpush.msrb.mxu0 %v382_v52  ;;  %491 = vmatpush.msrb.mxu1 %v383_v53  ;;  %v628_v50 = vld [vmem:[#allocation11 + $0x120] sm:$0xff]  ;;  %v629_v51 = vld [vmem:[#allocation11 + $0x128] sm:$0xff]  ;;  %v630_v52 = vld [vmem:[#allocation11 + $0x130] sm:$0xff] }
  0xf7   : > { %464 = vmatpush.msra.mxu3 %v303_v61  ;;  %440 = vmatpush.msra.mxu2 %v326_v23  ;;  %v625_v53 = vld [vmem:[#allocation11 + $0x108] sm:$0xff]  ;;  %v626_v54 = vld [vmem:[#allocation11 + $0x110] sm:$0xff]  ;;  %v623_v57 = vld [vmem:[#allocation11 + $0xf8] sm:$0xff] }
  0xf8   : > { %472 = vmatpush.msrb.mxu0 %v376_v55  ;;  %492 = vmatpush.msrb.mxu1 %v377_v56  ;;  %v627_v55 = vld [vmem:[#allocation11 + $0x118] sm:$0xff]  ;;  %v622_v56 = vld [vmem:[#allocation11 + $0xf0] sm:$0xff]  ;;  %v624_v58 = vld [vmem:[#allocation11 + $0x100] sm:$0xff] }
  0xf9   : > { %465 = vmatpush.msra.mxu3 %v297_v3  ;;  %441 = vmatpush.msra.mxu2 %v320_v26  ;;  %v621_v63 = vld [vmem:[#allocation11 + $0xe8] sm:$0xff]  ;;  %v511_v3 = vperm.slane %v1436_v1, 0  ;;  %v614_v17 = vld [vmem:[#allocation11 + $0xb0] sm:$0xff]  ;;  %v611_v23 = vld [vmem:[#allocation11 + $0x98] sm:$0xff] }
  0xfa   : > { %473 = vmatpush.msrb.mxu0 %v370_v59  ;;  %493 = vmatpush.msrb.mxu1 %v371_v60  ;;  %v619_v59 = vld [vmem:[#allocation11 + $0xd8] sm:$0xff]  ;;  %v620_v60 = vld [vmem:[#allocation11 + $0xe0] sm:$0xff]  ;;  %v617_v10 = vld [vmem:[#allocation11 + $0xc8] sm:$0xff] }
  0xfb   : > { %466 = vmatmul.f32.vlgmr.msra.gmra.mxu3 %v1325_v16  ;;  %442 = vmatpush.msra.mxu2 %v314_v29  ;;  %v609_v29 = vld [vmem:[#allocation11 + $0x88] sm:$0xff] }
  0xfc   : > { %474 = vmatpush.msrb.mxu0 %v364_v0  ;;  %494 = vmatpush.msrb.mxu1 %v365_v2 }
  0xfd   : > { %443 = vmatpush.msra.mxu2 %v308_v32  ;;  %660 = vmatpush.msrb.mxu3 %v638_v40  ;;  %v606_v32 = vld [vmem:[#allocation11 + $0x70] sm:$0xff]  ;;  %v595_v40 = vld [vmem:[#allocation11 + $0x18] sm:$0xff] }
  0xfe   : > { %475 = vmatpush.msrb.mxu0 %v358_v5  ;;  %495 = vmatpush.msrb.mxu1 %v359_v6  ;;  %v528_v6 = vld [vmem:[%s527_s25] ss:$8 sm:$0x7] }
  0xff   : > { %444 = vmatpush.msra.mxu2 %v302_v35  ;;  %661 = vmatpush.msrb.mxu3 %v635_v45  ;;  %v602_v35 = vld [vmem:[#allocation11 + $0x50] sm:$0xff]  ;;  %v593_v45 = vld [vmem:[#allocation11 + $0x8] sm:$0xff] }
 0x100   : > { %476 = vmatpush.msrb.mxu0 %v352_v8  ;;  %496 = vmatpush.msrb.mxu1 %v353_v9  ;;  %v616_v9 = vld [vmem:[#allocation11 + $0xc0] sm:$0xff] }
 0x101   : > { %445 = vmatpush.msra.mxu2 %v296_v38  ;;  %662 = vmatpush.msrb.mxu3 %v632_v48  ;;  %v599_v38 = vld [vmem:[#allocation11 + $0x38] sm:$0xff] }
 0x102   : > { %477 = vmatpush.msrb.mxu0 %v346_v11  ;;  %497 = vmatpush.msrb.mxu1 %v347_v12  ;;  %v618_v11 = vld [vmem:[#allocation11 + $0xd0] sm:$0xff] }
 0x103   : > { %446 = vmatmul.f32.vlgmr.msra.gmra.mxu2 %v1325_v16  ;;  %663 = vmatpush.msrb.mxu3 %v629_v51 }
 0x104   : > { %478 = vmatpush.msrb.mxu0 %v340_v14  ;;  %498 = vmatpush.msrb.mxu1 %v341_v15  ;;  %v613_v15 = vld [vmem:[#allocation11 + $0xa8] sm:$0xff] }
 0x105   : > { %640 = vmatpush.msrb.mxu2 %v637_v39  ;;  %664 = vmatpush.msrb.mxu3 %v626_v54  ;;  %v600_v39 = vld [vmem:[#allocation11 + $0x40] sm:$0xff] }
 0x106   : > { %479 = vmatpush.msrb.mxu0 %v334_v18  ;;  %499 = vmatpush.msrb.mxu1 %v335_v19  ;;  %v615_v18 = vld [vmem:[#allocation11 + $0xb8] sm:$0xff] }
 0x107   : > { %641 = vmatpush.msrb.mxu2 %v634_v44  ;;  %665 = vmatpush.msrb.mxu3 %v623_v57  ;;  %v592_v44 = vld [vmem:[#allocation11] sm:$0xff] }
 0x108   : > { %480 = vmatpush.msrb.mxu0 %v328_v21  ;;  %500 = vmatpush.msrb.mxu1 %v329_v22  ;;  %v610_v22 = vld [vmem:[#allocation11 + $0x90] sm:$0xff] }
 0x109   : > { %642 = vmatpush.msrb.mxu2 %v631_v47  ;;  %666 = vmatpush.msrb.mxu3 %v620_v60  ;;  %v594_v47 = vld [vmem:[#allocation11 + $0x10] sm:$0xff] }
 0x10a   : > { %481 = vmatpush.msrb.mxu0 %v322_v24  ;;  %501 = vmatpush.msrb.mxu1 %v323_v25  ;;  %v612_v24 = vld [vmem:[#allocation11 + $0xa0] sm:$0xff] }
 0x10b   : > { %643 = vmatpush.msrb.mxu2 %v628_v50  ;;  %667 = vmatpush.msrb.mxu3 %v617_v10 }
 0x10c   : > { %482 = vmatpush.msrb.mxu0 %v316_v27  ;;  %502 = vmatpush.msrb.mxu1 %v317_v28  ;;  %v607_v27 = vld [vmem:[#allocation11 + $0x78] sm:$0xff]  ;;  %v608_v28 = vld [vmem:[#allocation11 + $0x80] sm:$0xff] }
 0x10d   : > { %644 = vmatpush.msrb.mxu2 %v625_v53  ;;  %668 = vmatpush.msrb.mxu3 %v614_v17  ;;  %v513_v53 = vperm.slane %v1436_v1, 2  ;;  %v877_v1 = vld [vmem:[#allocation13 + $0xb8] sm:$0xff] (%p289_p1) }
 0x10e   : > { %483 = vmatpush.msrb.mxu0 %v310_v30  ;;  %503 = vmatpush.msrb.mxu1 %v311_v31  ;;  %v604_v30 = vld [vmem:[#allocation11 + $0x60] sm:$0xff]  ;;  %v605_v31 = vld [vmem:[#allocation11 + $0x68] sm:$0xff] }
 0x10f   : > { %645 = vmatpush.msrb.mxu2 %v622_v56  ;;  %669 = vmatpush.msrb.mxu3 %v611_v23 }
 0x110   : > { %484 = vmatpush.msrb.mxu0 %v304_v33  ;;  %504 = vmatpush.msrb.mxu1 %v305_v34  ;;  %v601_v34 = vld [vmem:[#allocation11 + $0x48] sm:$0xff] }
 0x111   : > { %646 = vmatpush.msrb.mxu2 %v619_v59  ;;  %670 = vmatpush.msrb.mxu3 %v608_v28 }
 0x112   : > { %485 = vmatpush.msrb.mxu0 %v298_v36  ;;  %505 = vmatpush.msrb.mxu1 %v299_v37  ;;  %v603_v36 = vld [vmem:[#allocation11 + $0x58] sm:$0xff]  ;;  %v598_v37 = vld [vmem:[#allocation11 + $0x30] sm:$0xff] }
 0x113   : > { %486 = vmatmul.f32.vlgmr.msrb.gmra.mxu0 %v1325_v16  ;;  %506 = vmatmul.f32.vlgmr.msrb.gmra.mxu1 %v1325_v16 }
 0x114   : > { %680 = vmatpush.msra.mxu0 %v639_v41  ;;  %647 = vmatpush.msrb.mxu2 %v616_v9  ;;  %v596_v41 = vld [vmem:[#allocation11 + $0x20] sm:$0xff] }
 0x115   : > { %671 = vmatpush.msrb.mxu3 %v605_v31 }
 0x116   : > { %681 = vmatpush.msra.mxu0 %v636_v46  ;;  %648 = vmatpush.msrb.mxu2 %v613_v15 }
 0x117   : > { %672 = vmatpush.msrb.mxu3 %v602_v35 }
 0x118   : > { %682 = vmatpush.msra.mxu0 %v633_v49  ;;  %649 = vmatpush.msrb.mxu2 %v610_v22 }
 0x119   : > { %673 = vmatpush.msrb.mxu3 %v599_v38 }
 0x11a   : > { %683 = vmatpush.msra.mxu0 %v630_v52  ;;  %650 = vmatpush.msrb.mxu2 %v607_v27 }
 0x11b   : > { %674 = vmatpush.msrb.mxu3 %v596_v41 }
 0x11c   : > { %684 = vmatpush.msra.mxu0 %v627_v55  ;;  %651 = vmatpush.msrb.mxu2 %v604_v30 }
 0x11d   : > { %675 = vmatpush.msrb.mxu3 %v593_v45 }
 0x11e   : > { %685 = vmatpush.msra.mxu0 %v624_v58  ;;  %652 = vmatpush.msrb.mxu2 %v601_v34 }
 0x120   : > { %686 = vmatpush.msra.mxu0 %v621_v63  ;;  %653 = vmatpush.msrb.mxu2 %v598_v37 }
 0x122   : > { %687 = vmatpush.msra.mxu0 %v618_v11  ;;  %654 = vmatpush.msrb.mxu2 %v595_v40 }
 0x124   : > { %688 = vmatpush.msra.mxu0 %v615_v18  ;;  %655 = vmatpush.msrb.mxu2 %v592_v44 }
 0x126   : > { %689 = vmatpush.msra.mxu0 %v612_v24 }
 0x128   : > { %690 = vmatpush.msra.mxu0 %v609_v29 }
 0x12a   : > { %691 = vmatpush.msra.mxu0 %v606_v32 }
 0x12c   : > { %692 = vmatpush.msra.mxu0 %v603_v36 }
 0x12e   : > { %693 = vmatpush.msra.mxu0 %v600_v39 }
 0x170   : > { %v407_v42 = vpop.f32.mrf.mxu0  ;;  %v1465_v43 = vpop.f32.mrf.mxu1 }
 0x171   : > { %v1472_v13 = vadd.f32 %v511_v3, %v407_v42  ;;  %v1477_v19 = vadd.f32 %v512_v7, %v1465_v43  ;;  %v597_v42 = vld [vmem:[#allocation11 + $0x28] sm:$0xff] }
 0x172   : > { %694 = vmatpush.msra.mxu0 %v597_v42 }
 0x174   : > { %695 = vmatpush.msra.mxu0 %v594_v47 }
 0x17e   : > { %v467_v61 = vpop.f32.mrf.mxu3 }
 0x186   : > { %v447_v56 = vpop.f32.mrf.mxu2 }
 0x190   : > { %v487_v0 = vpop.f32.mrf.mxu0  ;;  %v507_v2 = vpop.f32.mrf.mxu1 }
 0x191   : > { %v532_v4 = vrot.slane %v487_v0, 7  ;;  %v533_v5 = vrot.slane %v507_v2, 6 }
 0x193   : > { %v535_v8 = vsel %vm534_vm1, %v467_v61, %v532_v4  ;;  %v1484_v61 = vadd.f32 %v513_v53, %v447_v56 }
 0x194   : > { %v537_v12 = vsel %vm536_vm2, %v535_v8, %v533_v5 }
 0x195   : > { %v1474_v14 = vadd.f32 %v537_v12, %v528_v6 }
 0x197   : > { %v540_v20 = vadd.f32 %v1474_v14, %v1472_v13  ;;  %v561_v21 = vrot.slane %v1474_v14, 1  ;;  %v584_v7 = vrot.slane %v1474_v14, 2 }
 0x199   : > { %v1007_v25 = vmul.f32 -1.442695, %v540_v20  ;;  %v563_v26 = vadd.f32 %v561_v21, %v1477_v19 }
 0x19b   : > { %1043 = vpow2.f32 %v1007_v25  ;;  %v1008_v33 = vmul.f32 -1.442695, %v563_v26 }
 0x19d   : > { %1045 = vpow2.f32 %v1008_v33 }
 0x1a1   : > { %v1044_v43 = vpop.eup %1043 }
 0x1a2   : > { %v544_v46 = vadd.f32 1.0, %v1044_v43 }
 0x1a3   : > { %v1046_v48 = vpop.eup %1045 }
 0x1a4   : > { %1047 = vrcp.f32 %v544_v46  ;;  %v567_v49 = vadd.f32 1.0, %v1046_v48  ;;  %v556_v57 = vand.u32 2147483648, %v544_v46  ;;  %v554_v59 = vand.u32 2147483647, %v544_v46 }
 0x1a5   : > { %vm550_vm4 = vweird.f32 %v544_v46 }
 0x1a6   : > { %1049 = vrcp.f32 %v567_v49  ;;  %v557_v2 = vor.u32 1.1754944e-38, %v556_v57  ;;  %vm555_vm6 = vcmp.eq.f32.partialorder %v554_v59, 8.507059e+37  ;;  %v579_v8 = vand.u32 2147483648, %v567_v49 }
 0x1a7   : > { %vm573_vm8 = vweird.f32 %v567_v49  ;;  %v577_v9 = vand.u32 2147483647, %v567_v49 }
 0x1a8   : > { %v580_v12 = vor.u32 1.1754944e-38, %v579_v8  ;;  %v882_v8 = vld [vmem:[#allocation13 + $0xe0] sm:$0xff] (%p289_p1) }
 0x1a9   : > { %vm578_vm10 = vcmp.eq.f32.partialorder %v577_v9, 8.507059e+37  ;;  %v880_v9 = vld [vmem:[#allocation13 + $0xd0] sm:$0xff] (%p289_p1) }
 0x1aa   : > { %v1048_v50 = vpop.eup %1047 }
 0x1ab   : > { %v546_v51 = vmul.f32 %v1048_v50, %v544_v46  ;;  %vm551_vm3 = vweird.f32 %v1048_v50 }
 0x1ac   : > { %v1050_v52 = vpop.eup %1049  ;;  %vm552_vm5 = vmor %vm550_vm4, %vm551_vm3 }
 0x1ad   : > { %v547_v54 = vsub.f32 1.0, %v546_v51  ;;  %v569_v55 = vmul.f32 %v1050_v52, %v567_v49  ;;  %vm574_vm7 = vweird.f32 %v1050_v52 }
 0x1ae   : > { %vm575_vm9 = vmor %vm573_vm8, %vm574_vm7 }
 0x1af   : > { %v548_v58 = vmul.f32 %v1048_v50, %v547_v54  ;;  %v570_v60 = vsub.f32 1.0, %v569_v55 }
 0x1b1   : > { %v549_v63 = vadd.f32 %v1048_v50, %v548_v58  ;;  %v571_v0 = vmul.f32 %v1050_v52, %v570_v60  ;;  %v765_v60 = vstv %s764_s6 }
 0x1b2   : > { %vm766_vm4 = vcmp.eq.s32.totalorder %v765_v60, 1 }
 0x1b3   : > { %v553_v3 = vsel %vm552_vm5, %v1048_v50, %v549_v63  ;;  %v572_v5 = vadd.f32 %v1050_v52, %v571_v0  ;;  %vm940_vm5 = vcmp.lt.s32.totalorder (%p289_p1), %v275_v62, 256 }
 0x1b4   : > { %v558_v4 = vsel %vm555_vm6, %v557_v2, %v553_v3 }
 0x1b5   : > { %v583_v6 = vmul.f32 %v558_v4, %v1484_v61  ;;  %v576_v11 = vsel %vm575_vm9, %v1050_v52, %v572_v5  ;;  %v885_v5 = vld [vmem:[#allocation13 + $0xf8] sm:$0xff] (%p289_p1) }
 0x1b6   : > { %v581_v15 = vsel %vm578_vm10, %v580_v12, %v576_v11  ;;  %912 = vmatpush.msra.mxu3 (%p289_p1), %v885_v5  ;;  %828 = vmatpush.msra.mxu1 (%p289_p1), %v885_v5  ;;  %v878_v11 = vld [vmem:[#allocation13 + $0xc0] sm:$0xff] (%p289_p1)  ;;  %v876_v12 = vld [vmem:[#allocation13 + $0xb0] sm:$0xff] (%p289_p1) }
 0x1b7   : > { %v586_v10 = vadd.f32 %v584_v7, %v583_v6  ;;  %v588_v17 = vsub.f32 1.0, %v581_v15  ;;  %v590_v21 = vmul.f32 %v1325_v16, %v581_v15  ;;  %v884_v6 = vld [vmem:[#allocation13 + $0xf0] sm:$0xff] (%p289_p1)  ;;  %v883_v7 = vld [vmem:[#allocation13 + $0xe8] sm:$0xff] (%p289_p1) }
 0x1b8   :  { %892 = vmatpush.msra.mxu2 (%p289_p1), %v884_v6  ;;  %913 = vmatpush.msra.mxu3 (%p289_p1), %v883_v7  ;;  %v875_v15 = vld [vmem:[#allocation13 + $0xa8] sm:$0xff] (%p289_p1) }
 0x1b9   : > { %1051 = vtanh.f32 %v586_v10  ;;  %v879_v10 = vld [vmem:[#allocation13 + $0xc8] sm:$0xff] (%p289_p1)  ;;  %829 = vmatpush.msra.mxu1 (%p289_p1), %v883_v7 }
 0x1ba   :  { %893 = vmatpush.msra.mxu2 (%p289_p1), %v882_v8 }
 0x1bc   :  { %894 = vmatpush.msra.mxu2 (%p289_p1), %v880_v9 }
 0x1be   :  { %895 = vmatpush.msra.mxu2 (%p289_p1), %v878_v11 }
 0x1bf   : > { %v1052_v18 = vpop.eup %1051 }
 0x1c0   : > { %v589_v20 = vmul.f32 %v1052_v18, %v588_v17  ;;  %v874_v17 = vld [vmem:[#allocation13 + $0xa0] sm:$0xff] (%p289_p1)  ;;  %896 = vmatpush.msra.mxu2 (%p289_p1), %v876_v12  ;;  %v873_v18 = vld [vmem:[#allocation13 + $0x98] sm:$0xff] (%p289_p1) }
 0x1c2   : > { %v591_v22 = vadd.f32 %v590_v21, %v589_v20  ;;  %v872_v20 = vld [vmem:[#allocation13 + $0x90] sm:$0xff] (%p289_p1)  ;;  %897 = vmatpush.msra.mxu2 (%p289_p1), %v874_v17  ;;  %v871_v21 = vld [vmem:[#allocation13 + $0x88] sm:$0xff] (%p289_p1) }
 0x1c4   : > { %656 = vmatmul.f32.vlgmr.msrb.gmra.mxu2 %v591_v22  ;;  %676 = vmatmul.f32.vlgmr.msrb.gmra.mxu3 %v591_v22 }
 0x1c5   : > { %696 = vmatmul.f32.vlgmr.msra.gmra.mxu0 %v591_v22  ;;  %v870_v22 = vld [vmem:[#allocation13 + $0x80] sm:$0xff] (%p289_p1)  ;;  %898 = vmatpush.msra.mxu2 (%p289_p1), %v872_v20 }
 0x1c6   :  { %808 = vmatpush.msra.mxu0 (%p289_p1), %v884_v6 }
 0x1c7   :  { %899 = vmatpush.msra.mxu2 (%p289_p1), %v870_v22 }
 0x1c8   :  { %809 = vmatpush.msra.mxu0 (%p289_p1), %v882_v8 }
 0x1ca   :  { %810 = vmatpush.msra.mxu0 (%p289_p1), %v880_v9 }
 0x1cc   :  { %811 = vmatpush.msra.mxu0 (%p289_p1), %v878_v11 }
 0x1ce   :  { %812 = vmatpush.msra.mxu0 (%p289_p1), %v876_v12 }
 0x1d0   :  { %813 = vmatpush.msra.mxu0 (%p289_p1), %v874_v17 }
 0x1d2   :  { %814 = vmatpush.msra.mxu0 (%p289_p1), %v872_v20 }
 0x1d4   :  { %815 = vmatpush.msra.mxu0 (%p289_p1), %v870_v22 }
 0x242   : > { %v697_v23 = vpop.f32.mrf.mxu0 }
 0x243   : > { %v704_v26 = vrot.slane %v697_v23, 6  ;;  %v869_v23 = vld [vmem:[#allocation13 + $0x78] sm:$0xff] (%p289_p1) }
 0x247   : > { %v677_v24 = vpop.f32.mrf.mxu3  ;;  %v657_v27 = vpop.f32.mrf.mxu2 }
 0x248   : > { %v703_v25 = vrot.slane %v677_v24, 7  ;;  %v868_v24 = vld [vmem:[#allocation13 + $0x70] sm:$0xff] (%p289_p1) }
 0x249   :  { %900 = vmatpush.msra.mxu2 (%p289_p1), %v868_v24  ;;  %816 = vmatpush.msra.mxu0 (%p289_p1), %v868_v24 }
 0x24a   : > { %v705_v28 = vsel %vm534_vm1, %v657_v27, %v703_v25  ;;  %v867_v25 = vld [vmem:[#allocation13 + $0x68] sm:$0xff] (%p289_p1)  ;;  %v865_v27 = vld [vmem:[#allocation13 + $0x58] sm:$0xff] (%p289_p1) }
 0x24b   : > { %v706_v29 = vsel %vm536_vm2, %v705_v28, %v704_v26  ;;  %v866_v26 = vld [vmem:[#allocation13 + $0x60] sm:$0xff] (%p289_p1)  ;;  %v864_v28 = vld [vmem:[#allocation13 + $0x50] sm:$0xff] (%p289_p1) }
 0x24c   : > { %v708_v30 = vadd.f32 %v706_v29, %v1474_v14  ;;  %901 = vmatpush.msra.mxu2 (%p289_p1), %v866_v26  ;;  %v863_v29 = vld [vmem:[#allocation13 + $0x48] sm:$0xff] (%p289_p1)  ;;  %817 = vmatpush.msra.mxu0 (%p289_p1), %v866_v26 }
 0x24e   : > { %v709_v31 = vadd.f32 %v708_v30, %v1472_v13  ;;  %v730_v32 = vrot.slane %v708_v30, 1  ;;  %v753_v54 = vrot.slane %v708_v30, 2  ;;  %v862_v30 = vld [vmem:[#allocation13 + $0x40] sm:$0xff] (%p289_p1)  ;;  %902 = vmatpush.msra.mxu2 (%p289_p1), %v864_v28  ;;  %818 = vmatpush.msra.mxu0 (%p289_p1), %v864_v28 }
 0x250   : > { %v1009_v33 = vmul.f32 -1.442695, %v709_v31  ;;  %v732_v34 = vadd.f32 %v730_v32, %v1477_v19  ;;  %v861_v31 = vld [vmem:[#allocation13 + $0x38] sm:$0xff] (%p289_p1)  ;;  %v860_v32 = vld [vmem:[#allocation13 + $0x30] sm:$0xff] (%p289_p1)  ;;  %903 = vmatpush.msra.mxu2 (%p289_p1), %v862_v30  ;;  %819 = vmatpush.msra.mxu0 (%p289_p1), %v862_v30 }
 0x252   : > { %1053 = vpow2.f32 %v1009_v33  ;;  %v1010_v35 = vmul.f32 -1.442695, %v732_v34  ;;  %v859_v33 = vld [vmem:[#allocation13 + $0x28] sm:$0xff] (%p289_p1)  ;;  %v858_v34 = vld [vmem:[#allocation13 + $0x20] sm:$0xff] (%p289_p1)  ;;  %904 = vmatpush.msra.mxu2 (%p289_p1), %v860_v32  ;;  %820 = vmatpush.msra.mxu0 (%p289_p1), %v860_v32 }
 0x254   : > { %1055 = vpow2.f32 %v1010_v35  ;;  %v857_v35 = vld [vmem:[#allocation13 + $0x18] sm:$0xff] (%p289_p1)  ;;  %905 = vmatpush.msra.mxu2 (%p289_p1), %v858_v34  ;;  %821 = vmatpush.msra.mxu0 (%p289_p1), %v858_v34 }
 0x258   : > { %v1054_v36 = vpop.eup %1053 }
 0x259   : > { %v713_v37 = vadd.f32 1.0, %v1054_v36  ;;  %v856_v36 = vld [vmem:[#allocation13 + $0x10] sm:$0xff] (%p289_p1) }
 0x25a   : > { %v1056_v38 = vpop.eup %1055  ;;  %906 = vmatpush.msra.mxu2 (%p289_p1), %v856_v36  ;;  %822 = vmatpush.msra.mxu0 (%p289_p1), %v856_v36 }
 0x25b   : > { %1057 = vrcp.f32 %v713_v37  ;;  %v736_v39 = vadd.f32 1.0, %v1056_v38  ;;  %v725_v14 = vand.u32 2147483648, %v713_v37  ;;  %v723_v45 = vand.u32 2147483647, %v713_v37  ;;  %v854_v38 = vld [vmem:[#allocation13] sm:$0xff] (%p289_p1) }
 0x25c   : > { %vm719_vm12 = vweird.f32 %v713_v37  ;;  %907 = vmatpush.msra.mxu2 (%p289_p1), %v854_v38  ;;  %823 = vmatpush.msra.mxu0 (%p289_p1), %v854_v38 }
 0x25d   : > { %1059 = vrcp.f32 %v736_v39  ;;  %v726_v47 = vor.u32 1.1754944e-38, %v725_v14  ;;  %vm724_vm14 = vcmp.eq.f32.partialorder %v723_v45, 8.507059e+37  ;;  %v748_v52 = vand.u32 2147483648, %v736_v39 }
 0x25e   : > { %vm742_vm0 = vweird.f32 %v736_v39  ;;  %v746_v55 = vand.u32 2147483647, %v736_v39 }
 0x25f   : > { %v749_v58 = vor.u32 1.1754944e-38, %v748_v52 }
 0x260   : > { %vm747_vm3 = vcmp.eq.f32.partialorder %v746_v55, 8.507059e+37 }
 0x261   : > { %v1058_v40 = vpop.eup %1057 }
 0x262   : > { %v715_v41 = vmul.f32 %v1058_v40, %v713_v37  ;;  %vm720_vm11 = vweird.f32 %v1058_v40  ;;  %v855_v37 = vld [vmem:[#allocation13 + $0x8] sm:$0xff] (%p289_p1) }
 0x263   : > { %v1060_v42 = vpop.eup %1059  ;;  %vm721_vm13 = vmor %vm719_vm12, %vm720_vm11 }
 0x264   : > { %v716_v43 = vsub.f32 1.0, %v715_v41  ;;  %v738_v44 = vmul.f32 %v1060_v42, %v736_v39  ;;  %vm743_vm15 = vweird.f32 %v1060_v42 }
 0x265   : > { %vm744_vm2 = vmor %vm742_vm0, %vm743_vm15 }
 0x266   : > { %v717_v13 = vmul.f32 %v1058_v40, %v716_v43  ;;  %v739_v19 = vsub.f32 1.0, %v738_v44  ;;  %v886_v43 = vld [vmem:[#allocation16] sm:$0x3] (%p289_p1) }
 0x267   :  { %v888_v45 = vperm.slane (%p289_p1), %v886_v43, 0 }
 0x268   : > { %v718_v46 = vadd.f32 %v1058_v40, %v717_v13  ;;  %v740_v48 = vmul.f32 %v1060_v42, %v739_v19  ;;  %v889_v13 = vperm.slane (%p289_p1), %v886_v43, 1 }
 0x26a   : > { %v722_v49 = vsel %vm721_vm13, %v1058_v40, %v718_v46  ;;  %v741_v51 = vadd.f32 %v1060_v42, %v740_v48  ;;  %v802_v40 = vld [vmem:[#allocation16] sm:$0x3] (%p289_p1) }
 0x26b   : > { %v727_v50 = vsel %vm724_vm14, %v726_v47, %v722_v49  ;;  %v804_v41 = vperm.slane (%p289_p1), %v802_v40, 0 }
 0x26c   : > { %v752_v53 = vmul.f32 %v727_v50, %v1484_v61  ;;  %v745_v57 = vsel %vm744_vm2, %v1060_v42, %v741_v51  ;;  %v805_v42 = vperm.slane (%p289_p1), %v802_v40, 1 }
 0x26d   : > { %v750_v59 = vsel %vm747_vm3, %v749_v58, %v745_v57 }
 0x26e   : > { %v755_v56 = vadd.f32 %v753_v54, %v752_v53  ;;  %v757_v63 = vsub.f32 1.0, %v750_v59  ;;  %v759_v3 = vmul.f32 %v1325_v16, %v750_v59 }
 0x270   : > { %1061 = vtanh.f32 %v755_v56 }
 0x276   : > { %v1062_v0 = vpop.eup %1061 }
 0x277   : > { %v758_v2 = vmul.f32 %v1062_v0, %v757_v63 }
 0x279   : > { %v760_v61 = vadd.f32 %v759_v3, %v758_v2  ;;  %291 = sbr.rel (!%p289_p1) target bundleno = 211 (0xd3), region = 125 }
 0x27b   : > { %762 = vst [vmem:[%s761_s26] sm:$0x1] %v760_v61  ;;  %v1499_v16 = vsel %vm766_vm4, %v760_v61, %v1325_v16  }
 0x27c   : > { %v1535_v4 = vmov %v1499_v16 }
 0x27d   : > { %v1536_v16 = vmov %v1535_v4  ;;  %768 = vst [vmem:[#allocation2] sm:$0x1] (%p289_p1), %v1535_v4  ;;  %908 = vmatmul.f32.vlgmr.msra.gmra.mxu2 (%p289_p1), %v1535_v4 }
 0x27e   :  { %853 = vst [vmem:[#allocation18] sm:$0x1] %v1535_v4  ;;  %v881_v16 = vld [vmem:[#allocation13 + $0xd8] sm:$0xff] }
 0x27f   :  { %914 = vmatpush.msra.mxu3 %v881_v16  ;;  %830 = vmatpush.msra.mxu1 %v881_v16  ;;  %964 = dma.vmem_to_hbm [thread:$0]  %s960_s28, 16, %s962_s30, [#allocation19]  }
 0x281   :  { %915 = vmatpush.msra.mxu3 %v879_v10  ;;  %831 = vmatpush.msra.mxu1 %v879_v10 }
 0x282   :  { %v769_v39 = vld [vmem:[#allocation4] sm:$0xff] }
 0x283   :  { %916 = vmatpush.msra.mxu3 %v877_v1  ;;  %832 = vmatpush.msra.mxu1 %v877_v1 }
 0x284   :  { %824 = vmatmul.f32.vlgmr.msra.gmra.mxu0 %v769_v39 }
 0x285   :  { %917 = vmatpush.msra.mxu3 %v875_v15  ;;  %833 = vmatpush.msra.mxu1 %v875_v15 }
 0x287   :  { %918 = vmatpush.msra.mxu3 %v873_v18  ;;  %834 = vmatpush.msra.mxu1 %v873_v18 }
 0x289   :  { %919 = vmatpush.msra.mxu3 %v871_v21  ;;  %835 = vmatpush.msra.mxu1 %v871_v21 }
 0x28b   :  { %920 = vmatpush.msra.mxu3 %v869_v23  ;;  %836 = vmatpush.msra.mxu1 %v869_v23 }
 0x28d   :  { %921 = vmatpush.msra.mxu3 %v867_v25  ;;  %837 = vmatpush.msra.mxu1 %v867_v25 }
 0x28f   :  { %922 = vmatpush.msra.mxu3 %v865_v27  ;;  %838 = vmatpush.msra.mxu1 %v865_v27 }
 0x291   :  { %923 = vmatpush.msra.mxu3 %v863_v29  ;;  %839 = vmatpush.msra.mxu1 %v863_v29 }
 0x293   :  { %924 = vmatpush.msra.mxu3 %v861_v31  ;;  %840 = vmatpush.msra.mxu1 %v861_v31 }
 0x295   :  { %925 = vmatpush.msra.mxu3 %v859_v33  ;;  %841 = vmatpush.msra.mxu1 %v859_v33 }
 0x297   :  { %926 = vmatpush.msra.mxu3 %v857_v35  ;;  %842 = vmatpush.msra.mxu1 %v857_v35 }
 0x299   :  { %927 = vmatpush.msra.mxu3 %v855_v37  ;;  %843 = vmatpush.msra.mxu1 %v855_v37 }
 0x29a   :  { %928 = vmatmul.f32.vlgmr.msra.gmra.mxu3 %v1535_v4  ;;  %844 = vmatmul.f32.vlgmr.msra.gmra.mxu1 %v769_v39 }
 0x300   :  { %v909_v48 = vpop.f32.mrf.mxu2 }
 0x301   :  { %v825_v14 = vpop.f32.mrf.mxu0  ;;  %v910_v50 = vadd.f32 %v909_v48, %v888_v45 }
 0x302   :  { %v826_v19 = vadd.f32 %v825_v14, %v804_v41 }
 0x304   :  { %848 = vst [vmem:[#allocation17] sm:$0xff] %v826_v19 }
 0x317   :  { %v845_v44 = vpop.f32.mrf.mxu1 }
 0x318   :  { %v846_v46 = vadd.f32 %v845_v44, %v805_v42 }
 0x31a   :  { %849 = vst [vmem:[#allocation17 + $0x8] sm:$0xff] %v846_v46 }
 0x31b   :  { %953 = dma.vmem_to_hbm [thread:$0]  %s949_s14, 256, %s951_s2, [#allocation7]  }
 0x31d   :  { %v929_v47 = vpop.f32.mrf.mxu3 }
 0x31e   :  { %v930_v49 = vadd.f32 %v929_v47, %v889_v13 }
 0x320   :  { %v934_v51 = vrot.slane %v930_v49, 7 }
 0x322   :  { %v936_v52 = vsel %vm534_vm1, %v910_v50, %v934_v51 }
 0x323   :  { %942 = vst.msk [vmem:[#allocation20] sm:$0x3] %vm940_vm5, %v936_v52 }
 0x324   :  { %975 = dma.vmem_to_hbm [thread:$0]  %s971_s17, 32, %s973_s19, [#allocation19]  }
 0x325   :  { %1319 = dma.done.wait [#allocation7], 256  }
 0x326   :  { %1320 = vsyncadd [#allocation7], 4294967040 }
 0x327   :  { %1321 = dma.done.wait [#allocation19], 48  }
 0x328   :  { %1322 = vsyncadd [#allocation19], 4294967248 }
 0x329   :  { %988 = vsyncpa [#allocation6], 1 }
 0x32a   :  { %989 = vsyncpa [#allocation9], 1 }
 0x32b   :  { %990 = vsyncpa [#allocation12], 1 }
 0x32c   :  { %991 = vsyncpa [#allocation15], 1 }
 0x32d   :  { %992 = vsyncpa [#allocation7], 1 }
 0x32e   :  { %993 = vsyncpa [#allocation19], 1 }

</bundles_post_ra>
